<compile_context>
chip_gen: v6e
topology: v6e:2x2x1
jax: 0.10.0
libtpu: 0.0.40
codegen_flags: <defaults>
</compile_context>

<pallas_src>
import jax
import jax.numpy as jnp
from jax.experimental import pallas as pl
from jax.experimental.pallas import tpu as pltpu

# Tap order t = (dy + 1) * 3 + (dx + 1); matches the host-side w3 reshape.
_TAPS = tuple((dy, dx) for dy in (-1, 0, 1) for dx in (-1, 0, 1))


# ---------------------------------------------------------------------------
# Kernel 1: BN1 / BN2 batch statistics -> per-channel (scale, shift).
# grid = (phase, batch), both "arbitrary" (cross-batch reduction).
# ---------------------------------------------------------------------------
def _make_stats_kernel(batch, cin, cmid, hw, eps):
    inv_hw = 1.0 / float(hw)
    inv_cnt = 1.0 / float(batch * hw)

    def kernel(x_ref, gamma1_ref, beta1_ref, w1_ref, gamma2_ref, beta2_ref,
               scale1_ref, shift1_ref, scale2_ref, shift2_ref,
               c1, s1, q1, sc1, sh1, c2, s2, q2):
        p = pl.program_id(0)
        n = pl.program_id(1)
        last = pl.num_programs(1) - 1
        xn = x_ref[0]                                             # (cin, hw)

        # ---------------- phase 0: BN1 batch statistics -----------------
        @pl.when(jnp.logical_and(p == 0, n == 0))
        def _():
            # Per-channel offset (first sample's mean) keeps the shifted
            # moments well-conditioned: var = E[(x-c)^2] - E[x-c]^2.
            c1[...] = jnp.sum(xn, axis=1, keepdims=True) * inv_hw
            s1[...] = jnp.zeros_like(s1)
            q1[...] = jnp.zeros_like(q1)

        @pl.when(p == 0)
        def _():
            d = xn - c1[...]
            s1[...] += jnp.sum(d, axis=1, keepdims=True)
            q1[...] += jnp.sum(d * d, axis=1, keepdims=True)

        @pl.when(jnp.logical_and(p == 0, n == last))
        def _():
            m = s1[...] * inv_cnt                                 # E[x] - c1
            var = jnp.maximum(q1[...] * inv_cnt - m * m, 0.0)
            sc = gamma1_ref[...] * jax.lax.rsqrt(var + eps)
            sc1[...] = sc
            sh1[...] = beta1_ref[...] - (c1[...] + m) * sc

        # --- phase 1: BN2 stats of y1 = conv1x1(relu(bn1(x))) (no bias1) ---
        # bias1 is dropped here AND in the main kernel: a per-channel constant
        # on y1 cancels exactly in BN2's mean subtraction (training mode).
        @pl.when(p == 1)
        def _():
            a1 = jnp.maximum(xn * sc1[...] + sh1[...], 0.0)       # (cin, hw)
            y1 = jnp.dot(w1_ref[...], a1,
                         preferred_element_type=jnp.float32)      # (cmid, hw)

            @pl.when(n == 0)
            def _():
                c2[...] = jnp.sum(y1, axis=1, keepdims=True) * inv_hw
                s2[...] = jnp.zeros_like(s2)
                q2[...] = jnp.zeros_like(q2)

            d = y1 - c2[...]
            s2[...] += jnp.sum(d, axis=1, keepdims=True)
            q2[...] += jnp.sum(d * d, axis=1, keepdims=True)

            @pl.when(n == last)
            def _():
                m2 = s2[...] * inv_cnt
                var2 = jnp.maximum(q2[...] * inv_cnt - m2 * m2, 0.0)
                sc2 = gamma2_ref[...] * jax.lax.rsqrt(var2 + eps)
                scale1_ref[...] = sc1[...]
                shift1_ref[...] = sh1[...]
                scale2_ref[...] = sc2
                shift2_ref[...] = beta2_ref[...] - (c2[...] + m2) * sc2

    return kernel


# ---------------------------------------------------------------------------
# Kernel 2: per-image fused BN1+ReLU -> 1x1 -> BN2+ReLU -> 3x3 -> concat.
# grid = (batch,), dimension_semantics = ("parallel",).
# ---------------------------------------------------------------------------
def _make_main_kernel(cin, cmid, growth, width, hw, padg, conv_dtype):
    def kernel(x_ref, scale1_ref, shift1_ref, w1_ref, scale2_ref, shift2_ref,
               w3_ref, bias3_ref, maskl_ref, maskr_ref, out_ref, pad_ref):
        xn = x_ref[0]                                             # (cin, hw)
        # torch.cat([x, out], dim=1): pass-through copy while x is resident.
        out_ref[0, 0:cin, :] = xn

        # BN1 + ReLU (precomputed affine), 1x1 conv on the MXU (bias1 dropped).
        a1 = jnp.maximum(xn * scale1_ref[...] + shift1_ref[...], 0.0)
        y1 = jnp.dot(w1_ref[...], a1, preferred_element_type=jnp.float32)
        # BN2 + ReLU.
        a2 = jnp.maximum(y1 * scale2_ref[...] + shift2_ref[...], 0.0)

        # Zero-halo'd flat buffer (padding applied AFTER BN2+ReLU, so the halo
        # is exactly the zeros nn.Conv2d(padding=1) sees).  Only the two halo
        # strips are zeroed, and they are re-zeroed every grid step so the
        # kernel stays correct if megacore partitions the parallel batch axis
        # (scratch is per-core).
        pad_ref[:, 0:padg] = jnp.zeros((cmid, padg), conv_dtype)
        pad_ref[:, padg + hw:padg + hw + padg] = jnp.zeros((cmid, padg),
                                                           conv_dtype)
        pad_ref[:, padg:padg + hw] = a2.astype(conv_dtype)

        # 3x3 conv: nine small accumulated MXU dots read straight off pad_ref
        # (no im2col materialization).  Row-wrap correction is applied to the
        # dx=-1 / dx=+1 PARTIAL sums (growth x hw) instead of the cmid x hw
        # tap windows.
        acc_l = jnp.zeros((growth, hw), jnp.float32)
        acc_c = jnp.zeros((growth, hw), jnp.float32)
        acc_r = jnp.zeros((growth, hw), jnp.float32)
        for t, (dy, dx) in enumerate(_TAPS):
            off = dy * width + dx
            win = pad_ref[:, padg + off:padg + off + hw]          # (cmid, hw)
            part = jnp.dot(w3_ref[t], win,
                           preferred_element_type=jnp.float32)    # (g, hw)
            if dx < 0:
                acc_l = acc_l + part
            elif dx == 0:
                acc_c = acc_c + part
            else:
                acc_r = acc_r + part
        y2 = (acc_l * maskl_ref[...] + acc_c + acc_r * maskr_ref[...]
              + bias3_ref[...])
        out_ref[0, cin:cin + growth, :] = y2

    return kernel


def _const_spec(shape, grid_rank):
    zeros = (0,) * len(shape)
    if grid_rank == 1:
        return pl.BlockSpec(shape, lambda n: zeros)
    return pl.BlockSpec(shape, lambda p, n: zeros)


# ---------------------------------------------------------------------------
# Host wrapper: metadata reshapes only (no transpose of x, no pad, no concat).
# ---------------------------------------------------------------------------
def dense_layer_forward(x_nchw, params, eps=1e-5, conv_dtype=jnp.float32):
    # conv_dtype: operand dtype for the 3x3 conv (pad buffer + w3 taps).
    # Pass jnp.bfloat16 on v6e/v7x production shapes (accumulation stays f32).
    N, cin, H, W = x_nchw.shape
    hw = H * W
    cmid = params["w1"].shape[0]
    growth = params["w3"].shape[0]
    padg = W + 1                       # halo just big enough for +-(W+1) shifts
    f32 = jnp.float32

    x3 = x_nchw.reshape(N, cin, hw).astype(f32)
    gamma1 = params["gamma1"].reshape(cin, 1).astype(f32)
    beta1 = params["beta1"].reshape(cin, 1).astype(f32)
    w1 = params["w1"].reshape(cmid, cin).astype(f32)              # (cmid, cin)
    gamma2 = params["gamma2"].reshape(cmid, 1).astype(f32)
    beta2 = params["beta2"].reshape(cmid, 1).astype(f32)
    # torch (g, cmid, 3, 3) -> (3, 3, g, cmid) -> (9, g, cmid); tap order
    # matches _TAPS (dy outer, dx inner).
    w3taps = jnp.transpose(params["w3"], (2, 3, 0, 1)).reshape(
        9, growth, cmid).astype(conv_dtype)
    bias3 = params["b3"].reshape(growth, 1).astype(f32)
    # NOTE: params["b1"] is intentionally unused -- it cancels exactly in BN2.

    # Row-wrap masks on OUTPUT columns for the dx=-1 / dx=+1 partial sums.
    col = jnp.arange(hw, dtype=jnp.int32) % W
    maskl = (col >= 1).astype(f32).reshape(1, hw)
    maskr = (col <= W - 2).astype(f32).reshape(1, hw)

    f32b = 4
    esz = jnp.dtype(conv_dtype).itemsize

    # ------------------------- pass 1: BN statistics -------------------------
    stats_kernel = _make_stats_kernel(N, cin, cmid, hw, eps)
    stats_est = f32b * (2 * cin * hw + 2 * cin + cmid * cin + 2 * cmid
                        + 7 * cin + 5 * cmid)
    scale1, shift1, scale2, shift2 = pl.pallas_call(
        stats_kernel,
        grid=(2, N),
        in_specs=[
            pl.BlockSpec((1, cin, hw), lambda p, n: (n, 0, 0)),
            _const_spec((cin, 1), 2), _const_spec((cin, 1), 2),
            _const_spec((cmid, cin), 2),
            _const_spec((cmid, 1), 2), _const_spec((cmid, 1), 2),
        ],
        out_specs=[_const_spec((cin, 1), 2), _const_spec((cin, 1), 2),
                   _const_spec((cmid, 1), 2), _const_spec((cmid, 1), 2)],
        out_shape=(jax.ShapeDtypeStruct((cin, 1), f32),
                   jax.ShapeDtypeStruct((cin, 1), f32),
                   jax.ShapeDtypeStruct((cmid, 1), f32),
                   jax.ShapeDtypeStruct((cmid, 1), f32)),
        scratch_shapes=[pltpu.VMEM((cin, 1), f32)] * 5
                     + [pltpu.VMEM((cmid, 1), f32)] * 3,
        compiler_params=pltpu.CompilerParams(
            dimension_semantics=("arbitrary", "arbitrary"),
            vmem_limit_bytes=int(min(100 << 20, max(16 << 20, 4 * stats_est)))),
    )(x3, gamma1, beta1, w1, gamma2, beta2)

    # --------------------------- pass 2: main fused --------------------------
    main_kernel = _make_main_kernel(cin, cmid, growth, W, hw, padg, conv_dtype)
    main_est = (f32b * (2 * cin * hw + 2 * (cin + growth) * hw)   # 2x-buffered blocks
                + f32b * (2 * cin + cmid * cin + 2 * cmid + growth + 2 * hw)
                + esz * (9 * growth * cmid + cmid * (hw + 2 * padg)))
    out3 = pl.pallas_call(
        main_kernel,
        grid=(N,),
        in_specs=[
            pl.BlockSpec((1, cin, hw), lambda n: (n, 0, 0)),
            _const_spec((cin, 1), 1), _const_spec((cin, 1), 1),
            _const_spec((cmid, cin), 1),
            _const_spec((cmid, 1), 1), _const_spec((cmid, 1), 1),
            _const_spec((9, growth, cmid), 1), _const_spec((growth, 1), 1),
            _const_spec((1, hw), 1), _const_spec((1, hw), 1),
        ],
        out_specs=pl.BlockSpec((1, cin + growth, hw), lambda n: (n, 0, 0)),
        out_shape=jax.ShapeDtypeStruct((N, cin + growth, hw), f32),
        scratch_shapes=[pltpu.VMEM((cmid, hw + 2 * padg), conv_dtype)],
        compiler_params=pltpu.CompilerParams(
            dimension_semantics=("parallel",),
            vmem_limit_bytes=int(min(100 << 20, max(16 << 20, 4 * main_est)))),
    )(x3, scale1, shift1, w1, scale2, shift2, w3taps, bias3, maskl, maskr)

    return out3.reshape(N, cin + growth, H, W)                    # NCHW


# ---------------------------------------------------------------------------
# Pure-JAX reference (same math as the PyTorch module in training mode).
# ---------------------------------------------------------------------------
def dense_layer_reference(x, params, eps=1e-5):
    x = x.astype(jnp.float32)

    def bn_relu(v, gamma, beta):
        mean = jnp.mean(v, axis=(0, 2, 3), keepdims=True)
        var = jnp.mean(jnp.square(v - mean), axis=(0, 2, 3), keepdims=True)
        vhat = (v - mean) * jax.lax.rsqrt(var + eps)
        return jnp.maximum(
            vhat * gamma.reshape(1, -1, 1, 1) + beta.reshape(1, -1, 1, 1), 0.0)

    a1 = bn_relu(x, params["gamma1"], params["beta1"])
    y1 = jax.lax.conv_general_dilated(
        a1, params["w1"], (1, 1), "VALID",
        dimension_numbers=("NCHW", "OIHW", "NCHW"),
        precision=jax.lax.Precision.HIGHEST) + params["b1"].reshape(1, -1, 1, 1)
    a2 = bn_relu(y1, params["gamma2"], params["beta2"])
    y2 = jax.lax.conv_general_dilated(
        a2, params["w3"], (1, 1), ((1, 1), (1, 1)),
        dimension_numbers=("NCHW", "OIHW", "NCHW"),
        precision=jax.lax.Precision.HIGHEST) + params["b3"].reshape(1, -1, 1, 1)
    return jnp.concatenate([x, y2], axis=1)


def init_params(key, input_dim, growth_rate):
    cmid = 4 * growth_rate
    ks = jax.random.split(key, 8)
    return {
        "gamma1": 1.0 + 0.1 * jax.random.normal(ks[0], (input_dim,), jnp.float32),
        "beta1": 0.1 * jax.random.normal(ks[1], (input_dim,), jnp.float32),
        "w1": 0.1 * jax.random.normal(ks[2], (cmid, input_dim, 1, 1), jnp.float32),
        "b1": 0.1 * jax.random.normal(ks[3], (cmid,), jnp.float32),
        "gamma2": 1.0 + 0.1 * jax.random.normal(ks[4], (cmid,), jnp.float32),
        "beta2": 0.1 * jax.random.normal(ks[5], (cmid,), jnp.float32),
        "w3": 0.1 * jax.random.normal(ks[6], (growth_rate, cmid, 3, 3), jnp.float32),
        "b3": 0.1 * jax.random.normal(ks[7], (growth_rate,), jnp.float32),
    }


if __name__ == "__main__":
    input_dim, growth_rate = 4, 8
    N, H, W = 2, 16, 16

    key = jax.random.PRNGKey(0)
    k_x, k_p = jax.random.split(key)
    x = jax.random.normal(k_x, (N, input_dim, H, W), jnp.float32)  # NCHW
    params = init_params(k_p, input_dim, growth_rate)

    fwd = jax.jit(dense_layer_forward)
    out = jax.block_until_ready(fwd(x, params))
    assert out.shape == (N, input_dim + growth_rate, H, W), out.shape

    ref = jax.block_until_ready(jax.jit(dense_layer_reference)(x, params))
    max_err = float(jnp.max(jnp.abs(out - ref)))
    assert max_err < 1e-3, f"max |pallas - reference| = {max_err}"

    print("KERNEL_OK")
</pallas_src>

<mosaic_0001>
module attributes {stable_mosaic.version = 11 : i64} {
  func.func @kernel(%arg0: i32, %arg1: i32, %arg2: memref<1x4x256xf32, #tpu.memory_space<vmem>>, %arg3: memref<4x1xf32, #tpu.memory_space<vmem>>, %arg4: memref<4x1xf32, #tpu.memory_space<vmem>>, %arg5: memref<32x4xf32, #tpu.memory_space<vmem>>, %arg6: memref<32x1xf32, #tpu.memory_space<vmem>>, %arg7: memref<32x1xf32, #tpu.memory_space<vmem>>, %arg8: memref<4x1xf32, #tpu.memory_space<vmem>>, %arg9: memref<4x1xf32, #tpu.memory_space<vmem>>, %arg10: memref<32x1xf32, #tpu.memory_space<vmem>>, %arg11: memref<32x1xf32, #tpu.memory_space<vmem>>, %arg12: memref<4x1xf32, #tpu.memory_space<vmem>>, %arg13: memref<4x1xf32, #tpu.memory_space<vmem>>, %arg14: memref<4x1xf32, #tpu.memory_space<vmem>>, %arg15: memref<4x1xf32, #tpu.memory_space<vmem>>, %arg16: memref<4x1xf32, #tpu.memory_space<vmem>>, %arg17: memref<32x1xf32, #tpu.memory_space<vmem>>, %arg18: memref<32x1xf32, #tpu.memory_space<vmem>>, %arg19: memref<32x1xf32, #tpu.memory_space<vmem>>) attributes {dimension_semantics = [#tpu.dimension_semantics<arbitrary>, #tpu.dimension_semantics<arbitrary>], iteration_bounds = array<i64: 2, 2>, scalar_prefetch = 0 : i64, scratch_operands = 8 : i64, tpu.core_type = #tpu.core_type<tc>, window_params = [{transform_indices = @transform_0, window_bounds = array<i64: 1, 4, 256>}, {pipeline_mode = #tpu.pipeline_mode<synchronous>, transform_indices = @transform_1, window_bounds = array<i64: 4, 1>}, {pipeline_mode = #tpu.pipeline_mode<synchronous>, transform_indices = @transform_2, window_bounds = array<i64: 4, 1>}, {pipeline_mode = #tpu.pipeline_mode<synchronous>, transform_indices = @transform_3, window_bounds = array<i64: 32, 4>}, {pipeline_mode = #tpu.pipeline_mode<synchronous>, transform_indices = @transform_4, window_bounds = array<i64: 32, 1>}, {pipeline_mode = #tpu.pipeline_mode<synchronous>, transform_indices = @transform_5, window_bounds = array<i64: 32, 1>}, {pipeline_mode = #tpu.pipeline_mode<synchronous>, transform_indices = @transform_6, window_bounds = array<i64: 4, 1>}, {pipeline_mode = #tpu.pipeline_mode<synchronous>, transform_indices = @transform_7, window_bounds = array<i64: 4, 1>}, {pipeline_mode = #tpu.pipeline_mode<synchronous>, transform_indices = @transform_8, window_bounds = array<i64: 32, 1>}, {pipeline_mode = #tpu.pipeline_mode<synchronous>, transform_indices = @transform_9, window_bounds = array<i64: 32, 1>}]} {
    %c0 = arith.constant 0 : index
    %c0_0 = arith.constant 0 : index
    %c0_1 = arith.constant 0 : index
    %0 = vector.load %arg2[%c0, %c0_0, %c0_1] : memref<1x4x256xf32, #tpu.memory_space<vmem>>, vector<1x4x256xf32>
    %1 = vector.shape_cast %0 : vector<1x4x256xf32> to vector<4x256xf32>
    %c0_i32 = arith.constant 0 : i32
    %2 = arith.cmpi eq, %arg0, %c0_i32 : i32
    %c0_i32_2 = arith.constant 0 : i32
    %3 = arith.cmpi eq, %arg1, %c0_i32_2 : i32
    %4 = arith.andi %2, %3 : i1
    %5 = arith.extui %4 : i1 to i32
    %c0_i32_3 = arith.constant 0 : i32
    %6 = arith.cmpi ne, %5, %c0_i32_3 : i32
    scf.if %6 {
      %cst = arith.constant dense<0.000000e+00> : vector<4xf32>
      %18 = vector.multi_reduction <add>, %1, %cst [1] : vector<4x256xf32> to vector<4xf32>
      %19 = vector.shape_cast %18 : vector<4xf32> to vector<4x1xf32>
      %cst_10 = arith.constant 3.906250e-03 : f32
      %20 = vector.broadcast %cst_10 : f32 to vector<4x1xf32>
      %21 = arith.mulf %19, %20 : vector<4x1xf32>
      %c0_11 = arith.constant 0 : index
      %c0_12 = arith.constant 0 : index
      %22 = vector.load %arg12[%c0_11, %c0_12] : memref<4x1xf32, #tpu.memory_space<vmem>>, vector<4x1xf32>
      tpu.vector_store %arg12[%c0_11, %c0_12], %21 {strides = array<i32>} : memref<4x1xf32, #tpu.memory_space<vmem>>, vector<4x1xf32>,
      %cst_13 = arith.constant 0.000000e+00 : f32
      %23 = vector.broadcast %cst_13 : f32 to vector<4x1xf32>
      %c0_14 = arith.constant 0 : index
      %c0_15 = arith.constant 0 : index
      %24 = vector.load %arg13[%c0_14, %c0_15] : memref<4x1xf32, #tpu.memory_space<vmem>>, vector<4x1xf32>
      tpu.vector_store %arg13[%c0_14, %c0_15], %23 {strides = array<i32>} : memref<4x1xf32, #tpu.memory_space<vmem>>, vector<4x1xf32>,
      %cst_16 = arith.constant 0.000000e+00 : f32
      %25 = vector.broadcast %cst_16 : f32 to vector<4x1xf32>
      %c0_17 = arith.constant 0 : index
      %c0_18 = arith.constant 0 : index
      %26 = vector.load %arg14[%c0_17, %c0_18] : memref<4x1xf32, #tpu.memory_space<vmem>>, vector<4x1xf32>
      tpu.vector_store %arg14[%c0_17, %c0_18], %25 {strides = array<i32>} : memref<4x1xf32, #tpu.memory_space<vmem>>, vector<4x1xf32>,
    } else {
    }
    %c0_i32_4 = arith.constant 0 : i32
    %7 = arith.cmpi eq, %arg0, %c0_i32_4 : i32
    %8 = arith.extui %7 : i1 to i32
    %c0_i32_5 = arith.constant 0 : i32
    %9 = arith.cmpi ne, %8, %c0_i32_5 : i32
    scf.if %9 {
      %c0_10 = arith.constant 0 : index
      %c0_11 = arith.constant 0 : index
      %18 = vector.load %arg12[%c0_10, %c0_11] : memref<4x1xf32, #tpu.memory_space<vmem>>, vector<4x1xf32>
      %19 = vector.broadcast %18 : vector<4x1xf32> to vector<4x256xf32>
      %20 = arith.subf %1, %19 : vector<4x256xf32>
      %c0_12 = arith.constant 0 : index
      %c0_13 = arith.constant 0 : index
      %21 = vector.load %arg13[%c0_12, %c0_13] : memref<4x1xf32, #tpu.memory_space<vmem>>, vector<4x1xf32>
      %cst = arith.constant dense<0.000000e+00> : vector<4xf32>
      %22 = vector.multi_reduction <add>, %20, %cst [1] : vector<4x256xf32> to vector<4xf32>
      %23 = vector.shape_cast %22 : vector<4xf32> to vector<4x1xf32>
      %24 = arith.addf %21, %23 : vector<4x1xf32>
      %c0_14 = arith.constant 0 : index
      %c0_15 = arith.constant 0 : index
      %25 = vector.load %arg13[%c0_14, %c0_15] : memref<4x1xf32, #tpu.memory_space<vmem>>, vector<4x1xf32>
      tpu.vector_store %arg13[%c0_14, %c0_15], %24 {strides = array<i32>} : memref<4x1xf32, #tpu.memory_space<vmem>>, vector<4x1xf32>,
      %c0_16 = arith.constant 0 : index
      %c0_17 = arith.constant 0 : index
      %26 = vector.load %arg14[%c0_16, %c0_17] : memref<4x1xf32, #tpu.memory_space<vmem>>, vector<4x1xf32>
      %27 = arith.mulf %20, %20 : vector<4x256xf32>
      %cst_18 = arith.constant dense<0.000000e+00> : vector<4xf32>
      %28 = vector.multi_reduction <add>, %27, %cst_18 [1] : vector<4x256xf32> to vector<4xf32>
      %29 = vector.shape_cast %28 : vector<4xf32> to vector<4x1xf32>
      %30 = arith.addf %26, %29 : vector<4x1xf32>
      %c0_19 = arith.constant 0 : index
      %c0_20 = arith.constant 0 : index
      %31 = vector.load %arg14[%c0_19, %c0_20] : memref<4x1xf32, #tpu.memory_space<vmem>>, vector<4x1xf32>
      tpu.vector_store %arg14[%c0_19, %c0_20], %30 {strides = array<i32>} : memref<4x1xf32, #tpu.memory_space<vmem>>, vector<4x1xf32>,
    } else {
    }
    %c0_i32_6 = arith.constant 0 : i32
    %10 = arith.cmpi eq, %arg0, %c0_i32_6 : i32
    %c1_i32 = arith.constant 1 : i32
    %11 = arith.cmpi eq, %arg1, %c1_i32 : i32
    %12 = arith.andi %10, %11 : i1
    %13 = arith.extui %12 : i1 to i32
    %c0_i32_7 = arith.constant 0 : i32
    %14 = arith.cmpi ne, %13, %c0_i32_7 : i32
    scf.if %14 {
      %c0_10 = arith.constant 0 : index
      %c0_11 = arith.constant 0 : index
      %18 = vector.load %arg13[%c0_10, %c0_11] : memref<4x1xf32, #tpu.memory_space<vmem>>, vector<4x1xf32>
      %cst = arith.constant 0.001953125 : f32
      %19 = vector.broadcast %cst : f32 to vector<4x1xf32>
      %20 = arith.mulf %18, %19 : vector<4x1xf32>
      %c0_12 = arith.constant 0 : index
      %c0_13 = arith.constant 0 : index
      %21 = vector.load %arg14[%c0_12, %c0_13] : memref<4x1xf32, #tpu.memory_space<vmem>>, vector<4x1xf32>
      %cst_14 = arith.constant 0.001953125 : f32
      %22 = vector.broadcast %cst_14 : f32 to vector<4x1xf32>
      %23 = arith.mulf %21, %22 : vector<4x1xf32>
      %24 = arith.mulf %20, %20 : vector<4x1xf32>
      %25 = arith.subf %23, %24 : vector<4x1xf32>
      %cst_15 = arith.constant 0.000000e+00 : f32
      %26 = vector.broadcast %cst_15 : f32 to vector<4x1xf32>
      %27 = arith.maximumf %25, %26 : vector<4x1xf32>
      %c0_16 = arith.constant 0 : index
      %c0_17 = arith.constant 0 : index
      %28 = vector.load %arg3[%c0_16, %c0_17] : memref<4x1xf32, #tpu.memory_space<vmem>>, vector<4x1xf32>
      %cst_18 = arith.constant 9.99999974E-6 : f32
      %29 = vector.broadcast %cst_18 : f32 to vector<4x1xf32>
      %30 = arith.addf %27, %29 : vector<4x1xf32>
      %31 = math.rsqrt %30 : vector<4x1xf32>
      %32 = arith.mulf %28, %31 : vector<4x1xf32>
      %c0_19 = arith.constant 0 : index
      %c0_20 = arith.constant 0 : index
      %33 = vector.load %arg15[%c0_19, %c0_20] : memref<4x1xf32, #tpu.memory_space<vmem>>, vector<4x1xf32>
      tpu.vector_store %arg15[%c0_19, %c0_20], %32 {strides = array<i32>} : memref<4x1xf32, #tpu.memory_space<vmem>>, vector<4x1xf32>,
      %c0_21 = arith.constant 0 : index
      %c0_22 = arith.constant 0 : index
      %34 = vector.load %arg4[%c0_21, %c0_22] : memref<4x1xf32, #tpu.memory_space<vmem>>, vector<4x1xf32>
      %c0_23 = arith.constant 0 : index
      %c0_24 = arith.constant 0 : index
      %35 = vector.load %arg12[%c0_23, %c0_24] : memref<4x1xf32, #tpu.memory_space<vmem>>, vector<4x1xf32>
      %36 = arith.addf %35, %20 : vector<4x1xf32>
      %37 = arith.mulf %36, %32 : vector<4x1xf32>
      %38 = arith.subf %34, %37 : vector<4x1xf32>
      %c0_25 = arith.constant 0 : index
      %c0_26 = arith.constant 0 : index
      %39 = vector.load %arg16[%c0_25, %c0_26] : memref<4x1xf32, #tpu.memory_space<vmem>>, vector<4x1xf32>
      tpu.vector_store %arg16[%c0_25, %c0_26], %38 {strides = array<i32>} : memref<4x1xf32, #tpu.memory_space<vmem>>, vector<4x1xf32>,
    } else {
    }
    %c1_i32_8 = arith.constant 1 : i32
    %15 = arith.cmpi eq, %arg0, %c1_i32_8 : i32
    %16 = arith.extui %15 : i1 to i32
    %c0_i32_9 = arith.constant 0 : i32
    %17 = arith.cmpi ne, %16, %c0_i32_9 : i32
    scf.if %17 {
      %c0_10 = arith.constant 0 : index
      %c0_11 = arith.constant 0 : index
      %18 = vector.load %arg15[%c0_10, %c0_11] : memref<4x1xf32, #tpu.memory_space<vmem>>, vector<4x1xf32>
      %19 = vector.broadcast %18 : vector<4x1xf32> to vector<4x256xf32>
      %20 = arith.mulf %1, %19 : vector<4x256xf32>
      %c0_12 = arith.constant 0 : index
      %c0_13 = arith.constant 0 : index
      %21 = vector.load %arg16[%c0_12, %c0_13] : memref<4x1xf32, #tpu.memory_space<vmem>>, vector<4x1xf32>
      %22 = vector.broadcast %21 : vector<4x1xf32> to vector<4x256xf32>
      %23 = arith.addf %20, %22 : vector<4x256xf32>
      %cst = arith.constant 0.000000e+00 : f32
      %24 = vector.broadcast %cst : f32 to vector<4x256xf32>
      %25 = arith.maximumf %23, %24 : vector<4x256xf32>
      %c0_14 = arith.constant 0 : index
      %c0_15 = arith.constant 0 : index
      %26 = vector.load %arg5[%c0_14, %c0_15] : memref<32x4xf32, #tpu.memory_space<vmem>>, vector<32x4xf32>
      %cst_16 = arith.constant dense<0.000000e+00> : vector<32x256xf32>
      %27 = tpu.matmul %26, %25, %cst_16 {dimension_numbers = #tpu.dot_dimension_numbers<[1], [0], [0], [1], [0, 0, 1, 1], [], []>} : vector<32x4xf32>, vector<4x256xf32>, vector<32x256xf32> -> vector<32x256xf32>
      %c0_i32_17 = arith.constant 0 : i32
      %28 = arith.cmpi eq, %arg1, %c0_i32_17 : i32
      %29 = arith.extui %28 : i1 to i32
      %c0_i32_18 = arith.constant 0 : i32
      %30 = arith.cmpi ne, %29, %c0_i32_18 : i32
      scf.if %30 {
        %cst_33 = arith.constant dense<0.000000e+00> : vector<32xf32>
        %48 = vector.multi_reduction <add>, %27, %cst_33 [1] : vector<32x256xf32> to vector<32xf32>
        %49 = vector.shape_cast %48 : vector<32xf32> to vector<32x1xf32>
        %cst_34 = arith.constant 3.906250e-03 : f32
        %50 = vector.broadcast %cst_34 : f32 to vector<32x1xf32>
        %51 = arith.mulf %49, %50 : vector<32x1xf32>
        %c0_35 = arith.constant 0 : index
        %c0_36 = arith.constant 0 : index
        %52 = vector.load %arg17[%c0_35, %c0_36] : memref<32x1xf32, #tpu.memory_space<vmem>>, vector<32x1xf32>
        tpu.vector_store %arg17[%c0_35, %c0_36], %51 {strides = array<i32>} : memref<32x1xf32, #tpu.memory_space<vmem>>, vector<32x1xf32>,
        %cst_37 = arith.constant 0.000000e+00 : f32
        %53 = vector.broadcast %cst_37 : f32 to vector<32x1xf32>
        %c0_38 = arith.constant 0 : index
        %c0_39 = arith.constant 0 : index
        %54 = vector.load %arg18[%c0_38, %c0_39] : memref<32x1xf32, #tpu.memory_space<vmem>>, vector<32x1xf32>
        tpu.vector_store %arg18[%c0_38, %c0_39], %53 {strides = array<i32>} : memref<32x1xf32, #tpu.memory_space<vmem>>, vector<32x1xf32>,
        %cst_40 = arith.constant 0.000000e+00 : f32
        %55 = vector.broadcast %cst_40 : f32 to vector<32x1xf32>
        %c0_41 = arith.constant 0 : index
        %c0_42 = arith.constant 0 : index
        %56 = vector.load %arg19[%c0_41, %c0_42] : memref<32x1xf32, #tpu.memory_space<vmem>>, vector<32x1xf32>
        tpu.vector_store %arg19[%c0_41, %c0_42], %55 {strides = array<i32>} : memref<32x1xf32, #tpu.memory_space<vmem>>, vector<32x1xf32>,
      } else {
      }
      %c0_19 = arith.constant 0 : index
      %c0_20 = arith.constant 0 : index
      %31 = vector.load %arg17[%c0_19, %c0_20] : memref<32x1xf32, #tpu.memory_space<vmem>>, vector<32x1xf32>
      %32 = vector.broadcast %31 : vector<32x1xf32> to vector<32x256xf32>
      %33 = arith.subf %27, %32 : vector<32x256xf32>
      %c0_21 = arith.constant 0 : index
      %c0_22 = arith.constant 0 : index
      %34 = vector.load %arg18[%c0_21, %c0_22] : memref<32x1xf32, #tpu.memory_space<vmem>>, vector<32x1xf32>
      %cst_23 = arith.constant dense<0.000000e+00> : vector<32xf32>
      %35 = vector.multi_reduction <add>, %33, %cst_23 [1] : vector<32x256xf32> to vector<32xf32>
      %36 = vector.shape_cast %35 : vector<32xf32> to vector<32x1xf32>
      %37 = arith.addf %34, %36 : vector<32x1xf32>
      %c0_24 = arith.constant 0 : index
      %c0_25 = arith.constant 0 : index
      %38 = vector.load %arg18[%c0_24, %c0_25] : memref<32x1xf32, #tpu.memory_space<vmem>>, vector<32x1xf32>
      tpu.vector_store %arg18[%c0_24, %c0_25], %37 {strides = array<i32>} : memref<32x1xf32, #tpu.memory_space<vmem>>, vector<32x1xf32>,
      %c0_26 = arith.constant 0 : index
      %c0_27 = arith.constant 0 : index
      %39 = vector.load %arg19[%c0_26, %c0_27] : memref<32x1xf32, #tpu.memory_space<vmem>>, vector<32x1xf32>
      %40 = arith.mulf %33, %33 : vector<32x256xf32>
      %cst_28 = arith.constant dense<0.000000e+00> : vector<32xf32>
      %41 = vector.multi_reduction <add>, %40, %cst_28 [1] : vector<32x256xf32> to vector<32xf32>
      %42 = vector.shape_cast %41 : vector<32xf32> to vector<32x1xf32>
      %43 = arith.addf %39, %42 : vector<32x1xf32>
      %c0_29 = arith.constant 0 : index
      %c0_30 = arith.constant 0 : index
      %44 = vector.load %arg19[%c0_29, %c0_30] : memref<32x1xf32, #tpu.memory_space<vmem>>, vector<32x1xf32>
      tpu.vector_store %arg19[%c0_29, %c0_30], %43 {strides = array<i32>} : memref<32x1xf32, #tpu.memory_space<vmem>>, vector<32x1xf32>,
      %c1_i32_31 = arith.constant 1 : i32
      %45 = arith.cmpi eq, %arg1, %c1_i32_31 : i32
      %46 = arith.extui %45 : i1 to i32
      %c0_i32_32 = arith.constant 0 : i32
      %47 = arith.cmpi ne, %46, %c0_i32_32 : i32
      scf.if %47 {
        %c0_33 = arith.constant 0 : index
        %c0_34 = arith.constant 0 : index
        %48 = vector.load %arg18[%c0_33, %c0_34] : memref<32x1xf32, #tpu.memory_space<vmem>>, vector<32x1xf32>
        %cst_35 = arith.constant 0.001953125 : f32
        %49 = vector.broadcast %cst_35 : f32 to vector<32x1xf32>
        %50 = arith.mulf %48, %49 : vector<32x1xf32>
        %c0_36 = arith.constant 0 : index
        %c0_37 = arith.constant 0 : index
        %51 = vector.load %arg19[%c0_36, %c0_37] : memref<32x1xf32, #tpu.memory_space<vmem>>, vector<32x1xf32>
        %cst_38 = arith.constant 0.001953125 : f32
        %52 = vector.broadcast %cst_38 : f32 to vector<32x1xf32>
        %53 = arith.mulf %51, %52 : vector<32x1xf32>
        %54 = arith.mulf %50, %50 : vector<32x1xf32>
        %55 = arith.subf %53, %54 : vector<32x1xf32>
        %cst_39 = arith.constant 0.000000e+00 : f32
        %56 = vector.broadcast %cst_39 : f32 to vector<32x1xf32>
        %57 = arith.maximumf %55, %56 : vector<32x1xf32>
        %c0_40 = arith.constant 0 : index
        %c0_41 = arith.constant 0 : index
        %58 = vector.load %arg6[%c0_40, %c0_41] : memref<32x1xf32, #tpu.memory_space<vmem>>, vector<32x1xf32>
        %cst_42 = arith.constant 9.99999974E-6 : f32
        %59 = vector.broadcast %cst_42 : f32 to vector<32x1xf32>
        %60 = arith.addf %57, %59 : vector<32x1xf32>
        %61 = math.rsqrt %60 : vector<32x1xf32>
        %62 = arith.mulf %58, %61 : vector<32x1xf32>
        %c0_43 = arith.constant 0 : index
        %c0_44 = arith.constant 0 : index
        %63 = vector.load %arg15[%c0_43, %c0_44] : memref<4x1xf32, #tpu.memory_space<vmem>>, vector<4x1xf32>
        %c0_45 = arith.constant 0 : index
        %c0_46 = arith.constant 0 : index
        %64 = vector.load %arg8[%c0_45, %c0_46] : memref<4x1xf32, #tpu.memory_space<vmem>>, vector<4x1xf32>
        tpu.vector_store %arg8[%c0_45, %c0_46], %63 {strides = array<i32>} : memref<4x1xf32, #tpu.memory_space<vmem>>, vector<4x1xf32>,
        %c0_47 = arith.constant 0 : index
        %c0_48 = arith.constant 0 : index
        %65 = vector.load %arg16[%c0_47, %c0_48] : memref<4x1xf32, #tpu.memory_space<vmem>>, vector<4x1xf32>
        %c0_49 = arith.constant 0 : index
        %c0_50 = arith.constant 0 : index
        %66 = vector.load %arg9[%c0_49, %c0_50] : memref<4x1xf32, #tpu.memory_space<vmem>>, vector<4x1xf32>
        tpu.vector_store %arg9[%c0_49, %c0_50], %65 {strides = array<i32>} : memref<4x1xf32, #tpu.memory_space<vmem>>, vector<4x1xf32>,
        %c0_51 = arith.constant 0 : index
        %c0_52 = arith.constant 0 : index
        %67 = vector.load %arg10[%c0_51, %c0_52] : memref<32x1xf32, #tpu.memory_space<vmem>>, vector<32x1xf32>
        tpu.vector_store %arg10[%c0_51, %c0_52], %62 {strides = array<i32>} : memref<32x1xf32, #tpu.memory_space<vmem>>, vector<32x1xf32>,
        %c0_53 = arith.constant 0 : index
        %c0_54 = arith.constant 0 : index
        %68 = vector.load %arg7[%c0_53, %c0_54] : memref<32x1xf32, #tpu.memory_space<vmem>>, vector<32x1xf32>
        %c0_55 = arith.constant 0 : index
        %c0_56 = arith.constant 0 : index
        %69 = vector.load %arg17[%c0_55, %c0_56] : memref<32x1xf32, #tpu.memory_space<vmem>>, vector<32x1xf32>
        %70 = arith.addf %69, %50 : vector<32x1xf32>
        %71 = arith.mulf %70, %62 : vector<32x1xf32>
        %72 = arith.subf %68, %71 : vector<32x1xf32>
        %c0_57 = arith.constant 0 : index
        %c0_58 = arith.constant 0 : index
        %73 = vector.load %arg11[%c0_57, %c0_58] : memref<32x1xf32, #tpu.memory_space<vmem>>, vector<32x1xf32>
        tpu.vector_store %arg11[%c0_57, %c0_58], %72 {strides = array<i32>} : memref<32x1xf32, #tpu.memory_space<vmem>>, vector<32x1xf32>,
      } else {
      }
    } else {
    }
    return
  }
  func.func @transform_0(%arg0: i32, %arg1: i32) -> (i32, i32, i32) {
    %c0_i32 = arith.constant 0 : i32
    %c0_i32_0 = arith.constant 0 : i32
    %c0_i32_1 = arith.constant 0 : i32
    return %arg1, %c0_i32, %c0_i32_0 : i32, i32, i32
  }
  func.func @transform_1(%arg0: i32, %arg1: i32) -> (i32, i32) {
    %c0_i32 = arith.constant 0 : i32
    %c0_i32_0 = arith.constant 0 : i32
    %c0_i32_1 = arith.constant 0 : i32
    return %c0_i32, %c0_i32_0 : i32, i32
  }
  func.func @transform_2(%arg0: i32, %arg1: i32) -> (i32, i32) {
    %c0_i32 = arith.constant 0 : i32
    %c0_i32_0 = arith.constant 0 : i32
    %c0_i32_1 = arith.constant 0 : i32
    return %c0_i32, %c0_i32_0 : i32, i32
  }
  func.func @transform_3(%arg0: i32, %arg1: i32) -> (i32, i32) {
    %c0_i32 = arith.constant 0 : i32
    %c0_i32_0 = arith.constant 0 : i32
    %c0_i32_1 = arith.constant 0 : i32
    return %c0_i32, %c0_i32_0 : i32, i32
  }
  func.func @transform_4(%arg0: i32, %arg1: i32) -> (i32, i32) {
    %c0_i32 = arith.constant 0 : i32
    %c0_i32_0 = arith.constant 0 : i32
    %c0_i32_1 = arith.constant 0 : i32
    return %c0_i32, %c0_i32_0 : i32, i32
  }
  func.func @transform_5(%arg0: i32, %arg1: i32) -> (i32, i32) {
    %c0_i32 = arith.constant 0 : i32
    %c0_i32_0 = arith.constant 0 : i32
    %c0_i32_1 = arith.constant 0 : i32
    return %c0_i32, %c0_i32_0 : i32, i32
  }
  func.func @transform_6(%arg0: i32, %arg1: i32) -> (i32, i32) {
    %c0_i32 = arith.constant 0 : i32
    %c0_i32_0 = arith.constant 0 : i32
    %c0_i32_1 = arith.constant 0 : i32
    return %c0_i32, %c0_i32_0 : i32, i32
  }
  func.func @transform_7(%arg0: i32, %arg1: i32) -> (i32, i32) {
    %c0_i32 = arith.constant 0 : i32
    %c0_i32_0 = arith.constant 0 : i32
    %c0_i32_1 = arith.constant 0 : i32
    return %c0_i32, %c0_i32_0 : i32, i32
  }
  func.func @transform_8(%arg0: i32, %arg1: i32) -> (i32, i32) {
    %c0_i32 = arith.constant 0 : i32
    %c0_i32_0 = arith.constant 0 : i32
    %c0_i32_1 = arith.constant 0 : i32
    return %c0_i32, %c0_i32_0 : i32, i32
  }
  func.func @transform_9(%arg0: i32, %arg1: i32) -> (i32, i32) {
    %c0_i32 = arith.constant 0 : i32
    %c0_i32_0 = arith.constant 0 : i32
    %c0_i32_1 = arith.constant 0 : i32
    return %c0_i32, %c0_i32_0 : i32, i32
  }
}

module attributes {stable_mosaic.version = 11 : i64} {
  func.func @kernel(%arg0: i32, %arg1: memref<1x4x256xf32, #tpu.memory_space<vmem>>, %arg2: memref<4x1xf32, #tpu.memory_space<vmem>>, %arg3: memref<4x1xf32, #tpu.memory_space<vmem>>, %arg4: memref<32x4xf32, #tpu.memory_space<vmem>>, %arg5: memref<32x1xf32, #tpu.memory_space<vmem>>, %arg6: memref<32x1xf32, #tpu.memory_space<vmem>>, %arg7: memref<9x8x32xf32, #tpu.memory_space<vmem>>, %arg8: memref<8x1xf32, #tpu.memory_space<vmem>>, %arg9: memref<1x256xf32, #tpu.memory_space<vmem>>, %arg10: memref<1x256xf32, #tpu.memory_space<vmem>>, %arg11: memref<1x12x256xf32, #tpu.memory_space<vmem>>, %arg12: memref<32x290xf32, #tpu.memory_space<vmem>>) attributes {dimension_semantics = [#tpu.dimension_semantics<parallel>], iteration_bounds = array<i64: 2>, scalar_prefetch = 0 : i64, scratch_operands = 1 : i64, tpu.core_type = #tpu.core_type<tc>, window_params = [{transform_indices = @transform_0, window_bounds = array<i64: 1, 4, 256>}, {pipeline_mode = #tpu.pipeline_mode<synchronous>, transform_indices = @transform_1, window_bounds = array<i64: 4, 1>}, {pipeline_mode = #tpu.pipeline_mode<synchronous>, transform_indices = @transform_2, window_bounds = array<i64: 4, 1>}, {pipeline_mode = #tpu.pipeline_mode<synchronous>, transform_indices = @transform_3, window_bounds = array<i64: 32, 4>}, {pipeline_mode = #tpu.pipeline_mode<synchronous>, transform_indices = @transform_4, window_bounds = array<i64: 32, 1>}, {pipeline_mode = #tpu.pipeline_mode<synchronous>, transform_indices = @transform_5, window_bounds = array<i64: 32, 1>}, {pipeline_mode = #tpu.pipeline_mode<synchronous>, transform_indices = @transform_6, window_bounds = array<i64: 9, 8, 32>}, {pipeline_mode = #tpu.pipeline_mode<synchronous>, transform_indices = @transform_7, window_bounds = array<i64: 8, 1>}, {pipeline_mode = #tpu.pipeline_mode<synchronous>, transform_indices = @transform_8, window_bounds = array<i64: 1, 256>}, {pipeline_mode = #tpu.pipeline_mode<synchronous>, transform_indices = @transform_9, window_bounds = array<i64: 1, 256>}, {transform_indices = @transform_10, window_bounds = array<i64: 1, 12, 256>}]} {
    %c0 = arith.constant 0 : index
    %c0_0 = arith.constant 0 : index
    %c0_1 = arith.constant 0 : index
    %0 = vector.load %arg1[%c0, %c0_0, %c0_1] : memref<1x4x256xf32, #tpu.memory_space<vmem>>, vector<1x4x256xf32>
    %1 = vector.shape_cast %0 : vector<1x4x256xf32> to vector<4x256xf32>
    %c0_2 = arith.constant 0 : index
    %c0_3 = arith.constant 0 : index
    %c0_4 = arith.constant 0 : index
    %2 = vector.load %arg11[%c0_2, %c0_3, %c0_4] : memref<1x12x256xf32, #tpu.memory_space<vmem>>, vector<1x4x256xf32>
    %3 = vector.shape_cast %2 : vector<1x4x256xf32> to vector<4x256xf32>
    %4 = vector.shape_cast %1 : vector<4x256xf32> to vector<1x4x256xf32>
    tpu.vector_store %arg11[%c0_2, %c0_3, %c0_4], %4 {strides = array<i32>} : memref<1x12x256xf32, #tpu.memory_space<vmem>>, vector<1x4x256xf32>,
    %c0_5 = arith.constant 0 : index
    %c0_6 = arith.constant 0 : index
    %5 = vector.load %arg2[%c0_5, %c0_6] : memref<4x1xf32, #tpu.memory_space<vmem>>, vector<4x1xf32>
    %6 = vector.broadcast %5 : vector<4x1xf32> to vector<4x256xf32>
    %7 = arith.mulf %1, %6 : vector<4x256xf32>
    %c0_7 = arith.constant 0 : index
    %c0_8 = arith.constant 0 : index
    %8 = vector.load %arg3[%c0_7, %c0_8] : memref<4x1xf32, #tpu.memory_space<vmem>>, vector<4x1xf32>
    %9 = vector.broadcast %8 : vector<4x1xf32> to vector<4x256xf32>
    %10 = arith.addf %7, %9 : vector<4x256xf32>
    %cst = arith.constant 0.000000e+00 : f32
    %11 = vector.broadcast %cst : f32 to vector<4x256xf32>
    %12 = arith.maximumf %10, %11 : vector<4x256xf32>
    %c0_9 = arith.constant 0 : index
    %c0_10 = arith.constant 0 : index
    %13 = vector.load %arg4[%c0_9, %c0_10] : memref<32x4xf32, #tpu.memory_space<vmem>>, vector<32x4xf32>
    %cst_11 = arith.constant dense<0.000000e+00> : vector<32x256xf32>
    %14 = tpu.matmul %13, %12, %cst_11 {dimension_numbers = #tpu.dot_dimension_numbers<[1], [0], [0], [1], [0, 0, 1, 1], [], []>} : vector<32x4xf32>, vector<4x256xf32>, vector<32x256xf32> -> vector<32x256xf32>
    %c0_12 = arith.constant 0 : index
    %c0_13 = arith.constant 0 : index
    %15 = vector.load %arg5[%c0_12, %c0_13] : memref<32x1xf32, #tpu.memory_space<vmem>>, vector<32x1xf32>
    %16 = vector.broadcast %15 : vector<32x1xf32> to vector<32x256xf32>
    %17 = arith.mulf %14, %16 : vector<32x256xf32>
    %c0_14 = arith.constant 0 : index
    %c0_15 = arith.constant 0 : index
    %18 = vector.load %arg6[%c0_14, %c0_15] : memref<32x1xf32, #tpu.memory_space<vmem>>, vector<32x1xf32>
    %19 = vector.broadcast %18 : vector<32x1xf32> to vector<32x256xf32>
    %20 = arith.addf %17, %19 : vector<32x256xf32>
    %cst_16 = arith.constant 0.000000e+00 : f32
    %21 = vector.broadcast %cst_16 : f32 to vector<32x256xf32>
    %22 = arith.maximumf %20, %21 : vector<32x256xf32>
    %cst_17 = arith.constant 0.000000e+00 : f32
    %23 = vector.broadcast %cst_17 : f32 to vector<32x17xf32>
    %c0_18 = arith.constant 0 : index
    %c0_19 = arith.constant 0 : index
    %24 = vector.load %arg12[%c0_18, %c0_19] : memref<32x290xf32, #tpu.memory_space<vmem>>, vector<32x17xf32>
    tpu.vector_store %arg12[%c0_18, %c0_19], %23 {strides = array<i32>} : memref<32x290xf32, #tpu.memory_space<vmem>>, vector<32x17xf32>,
    %cst_20 = arith.constant 0.000000e+00 : f32
    %25 = vector.broadcast %cst_20 : f32 to vector<32x17xf32>
    %c0_21 = arith.constant 0 : index
    %c273 = arith.constant 273 : index
    %26 = vector.load %arg12[%c0_21, %c273] : memref<32x290xf32, #tpu.memory_space<vmem>>, vector<32x17xf32>
    tpu.vector_store %arg12[%c0_21, %c273], %25 {strides = array<i32>} : memref<32x290xf32, #tpu.memory_space<vmem>>, vector<32x17xf32>,
    %c0_22 = arith.constant 0 : index
    %c17 = arith.constant 17 : index
    %27 = vector.load %arg12[%c0_22, %c17] : memref<32x290xf32, #tpu.memory_space<vmem>>, vector<32x256xf32>
    tpu.vector_store %arg12[%c0_22, %c17], %22 {strides = array<i32>} : memref<32x290xf32, #tpu.memory_space<vmem>>, vector<32x256xf32>,
    %cst_23 = arith.constant 0.000000e+00 : f32
    %28 = vector.broadcast %cst_23 : f32 to vector<8x256xf32>
    %cst_24 = arith.constant 0.000000e+00 : f32
    %29 = vector.broadcast %cst_24 : f32 to vector<8x256xf32>
    %cst_25 = arith.constant 0.000000e+00 : f32
    %30 = vector.broadcast %cst_25 : f32 to vector<8x256xf32>
    %c0_26 = arith.constant 0 : index
    %c0_27 = arith.constant 0 : index
    %31 = vector.load %arg12[%c0_26, %c0_27] : memref<32x290xf32, #tpu.memory_space<vmem>>, vector<32x256xf32>
    %c0_28 = arith.constant 0 : index
    %c0_29 = arith.constant 0 : index
    %c0_30 = arith.constant 0 : index
    %32 = vector.load %arg7[%c0_28, %c0_29, %c0_30] : memref<9x8x32xf32, #tpu.memory_space<vmem>>, vector<1x8x32xf32>
    %33 = vector.shape_cast %32 : vector<1x8x32xf32> to vector<8x32xf32>
    %cst_31 = arith.constant dense<0.000000e+00> : vector<8x256xf32>
    %34 = tpu.matmul %33, %31, %cst_31 {dimension_numbers = #tpu.dot_dimension_numbers<[1], [0], [0], [1], [0, 0, 1, 1], [], []>} : vector<8x32xf32>, vector<32x256xf32>, vector<8x256xf32> -> vector<8x256xf32>
    %35 = arith.addf %28, %34 : vector<8x256xf32>
    %c0_32 = arith.constant 0 : index
    %c1 = arith.constant 1 : index
    %36 = vector.load %arg12[%c0_32, %c1] : memref<32x290xf32, #tpu.memory_space<vmem>>, vector<32x256xf32>
    %c1_33 = arith.constant 1 : index
    %c0_34 = arith.constant 0 : index
    %c0_35 = arith.constant 0 : index
    %37 = vector.load %arg7[%c1_33, %c0_34, %c0_35] : memref<9x8x32xf32, #tpu.memory_space<vmem>>, vector<1x8x32xf32>
    %38 = vector.shape_cast %37 : vector<1x8x32xf32> to vector<8x32xf32>
    %cst_36 = arith.constant dense<0.000000e+00> : vector<8x256xf32>
    %39 = tpu.matmul %38, %36, %cst_36 {dimension_numbers = #tpu.dot_dimension_numbers<[1], [0], [0], [1], [0, 0, 1, 1], [], []>} : vector<8x32xf32>, vector<32x256xf32>, vector<8x256xf32> -> vector<8x256xf32>
    %40 = arith.addf %29, %39 : vector<8x256xf32>
    %c0_37 = arith.constant 0 : index
    %c2 = arith.constant 2 : index
    %41 = vector.load %arg12[%c0_37, %c2] : memref<32x290xf32, #tpu.memory_space<vmem>>, vector<32x256xf32>
    %c2_38 = arith.constant 2 : index
    %c0_39 = arith.constant 0 : index
    %c0_40 = arith.constant 0 : index
    %42 = vector.load %arg7[%c2_38, %c0_39, %c0_40] : memref<9x8x32xf32, #tpu.memory_space<vmem>>, vector<1x8x32xf32>
    %43 = vector.shape_cast %42 : vector<1x8x32xf32> to vector<8x32xf32>
    %cst_41 = arith.constant dense<0.000000e+00> : vector<8x256xf32>
    %44 = tpu.matmul %43, %41, %cst_41 {dimension_numbers = #tpu.dot_dimension_numbers<[1], [0], [0], [1], [0, 0, 1, 1], [], []>} : vector<8x32xf32>, vector<32x256xf32>, vector<8x256xf32> -> vector<8x256xf32>
    %45 = arith.addf %30, %44 : vector<8x256xf32>
    %c0_42 = arith.constant 0 : index
    %c16 = arith.constant 16 : index
    %46 = vector.load %arg12[%c0_42, %c16] : memref<32x290xf32, #tpu.memory_space<vmem>>, vector<32x256xf32>
    %c3 = arith.constant 3 : index
    %c0_43 = arith.constant 0 : index
    %c0_44 = arith.constant 0 : index
    %47 = vector.load %arg7[%c3, %c0_43, %c0_44] : memref<9x8x32xf32, #tpu.memory_space<vmem>>, vector<1x8x32xf32>
    %48 = vector.shape_cast %47 : vector<1x8x32xf32> to vector<8x32xf32>
    %cst_45 = arith.constant dense<0.000000e+00> : vector<8x256xf32>
    %49 = tpu.matmul %48, %46, %cst_45 {dimension_numbers = #tpu.dot_dimension_numbers<[1], [0], [0], [1], [0, 0, 1, 1], [], []>} : vector<8x32xf32>, vector<32x256xf32>, vector<8x256xf32> -> vector<8x256xf32>
    %50 = arith.addf %35, %49 : vector<8x256xf32>
    %c0_46 = arith.constant 0 : index
    %c17_47 = arith.constant 17 : index
    %51 = vector.load %arg12[%c0_46, %c17_47] : memref<32x290xf32, #tpu.memory_space<vmem>>, vector<32x256xf32>
    %c4 = arith.constant 4 : index
    %c0_48 = arith.constant 0 : index
    %c0_49 = arith.constant 0 : index
    %52 = vector.load %arg7[%c4, %c0_48, %c0_49] : memref<9x8x32xf32, #tpu.memory_space<vmem>>, vector<1x8x32xf32>
    %53 = vector.shape_cast %52 : vector<1x8x32xf32> to vector<8x32xf32>
    %cst_50 = arith.constant dense<0.000000e+00> : vector<8x256xf32>
    %54 = tpu.matmul %53, %51, %cst_50 {dimension_numbers = #tpu.dot_dimension_numbers<[1], [0], [0], [1], [0, 0, 1, 1], [], []>} : vector<8x32xf32>, vector<32x256xf32>, vector<8x256xf32> -> vector<8x256xf32>
    %55 = arith.addf %40, %54 : vector<8x256xf32>
    %c0_51 = arith.constant 0 : index
    %c18 = arith.constant 18 : index
    %56 = vector.load %arg12[%c0_51, %c18] : memref<32x290xf32, #tpu.memory_space<vmem>>, vector<32x256xf32>
    %c5 = arith.constant 5 : index
    %c0_52 = arith.constant 0 : index
    %c0_53 = arith.constant 0 : index
    %57 = vector.load %arg7[%c5, %c0_52, %c0_53] : memref<9x8x32xf32, #tpu.memory_space<vmem>>, vector<1x8x32xf32>
    %58 = vector.shape_cast %57 : vector<1x8x32xf32> to vector<8x32xf32>
    %cst_54 = arith.constant dense<0.000000e+00> : vector<8x256xf32>
    %59 = tpu.matmul %58, %56, %cst_54 {dimension_numbers = #tpu.dot_dimension_numbers<[1], [0], [0], [1], [0, 0, 1, 1], [], []>} : vector<8x32xf32>, vector<32x256xf32>, vector<8x256xf32> -> vector<8x256xf32>
    %60 = arith.addf %45, %59 : vector<8x256xf32>
    %c0_55 = arith.constant 0 : index
    %c32 = arith.constant 32 : index
    %61 = vector.load %arg12[%c0_55, %c32] : memref<32x290xf32, #tpu.memory_space<vmem>>, vector<32x256xf32>
    %c6 = arith.constant 6 : index
    %c0_56 = arith.constant 0 : index
    %c0_57 = arith.constant 0 : index
    %62 = vector.load %arg7[%c6, %c0_56, %c0_57] : memref<9x8x32xf32, #tpu.memory_space<vmem>>, vector<1x8x32xf32>
    %63 = vector.shape_cast %62 : vector<1x8x32xf32> to vector<8x32xf32>
    %cst_58 = arith.constant dense<0.000000e+00> : vector<8x256xf32>
    %64 = tpu.matmul %63, %61, %cst_58 {dimension_numbers = #tpu.dot_dimension_numbers<[1], [0], [0], [1], [0, 0, 1, 1], [], []>} : vector<8x32xf32>, vector<32x256xf32>, vector<8x256xf32> -> vector<8x256xf32>
    %65 = arith.addf %50, %64 : vector<8x256xf32>
    %c0_59 = arith.constant 0 : index
    %c33 = arith.constant 33 : index
    %66 = vector.load %arg12[%c0_59, %c33] : memref<32x290xf32, #tpu.memory_space<vmem>>, vector<32x256xf32>
    %c7 = arith.constant 7 : index
    %c0_60 = arith.constant 0 : index
    %c0_61 = arith.constant 0 : index
    %67 = vector.load %arg7[%c7, %c0_60, %c0_61] : memref<9x8x32xf32, #tpu.memory_space<vmem>>, vector<1x8x32xf32>
    %68 = vector.shape_cast %67 : vector<1x8x32xf32> to vector<8x32xf32>
    %cst_62 = arith.constant dense<0.000000e+00> : vector<8x256xf32>
    %69 = tpu.matmul %68, %66, %cst_62 {dimension_numbers = #tpu.dot_dimension_numbers<[1], [0], [0], [1], [0, 0, 1, 1], [], []>} : vector<8x32xf32>, vector<32x256xf32>, vector<8x256xf32> -> vector<8x256xf32>
    %70 = arith.addf %55, %69 : vector<8x256xf32>
    %c0_63 = arith.constant 0 : index
    %c34 = arith.constant 34 : index
    %71 = vector.load %arg12[%c0_63, %c34] : memref<32x290xf32, #tpu.memory_space<vmem>>, vector<32x256xf32>
    %c8 = arith.constant 8 : index
    %c0_64 = arith.constant 0 : index
    %c0_65 = arith.constant 0 : index
    %72 = vector.load %arg7[%c8, %c0_64, %c0_65] : memref<9x8x32xf32, #tpu.memory_space<vmem>>, vector<1x8x32xf32>
    %73 = vector.shape_cast %72 : vector<1x8x32xf32> to vector<8x32xf32>
    %cst_66 = arith.constant dense<0.000000e+00> : vector<8x256xf32>
    %74 = tpu.matmul %73, %71, %cst_66 {dimension_numbers = #tpu.dot_dimension_numbers<[1], [0], [0], [1], [0, 0, 1, 1], [], []>} : vector<8x32xf32>, vector<32x256xf32>, vector<8x256xf32> -> vector<8x256xf32>
    %75 = arith.addf %60, %74 : vector<8x256xf32>
    %c0_67 = arith.constant 0 : index
    %c0_68 = arith.constant 0 : index
    %76 = vector.load %arg9[%c0_67, %c0_68] : memref<1x256xf32, #tpu.memory_space<vmem>>, vector<1x256xf32>
    %77 = vector.broadcast %76 : vector<1x256xf32> to vector<8x256xf32>
    %78 = arith.mulf %65, %77 : vector<8x256xf32>
    %79 = arith.addf %78, %70 : vector<8x256xf32>
    %c0_69 = arith.constant 0 : index
    %c0_70 = arith.constant 0 : index
    %80 = vector.load %arg10[%c0_69, %c0_70] : memref<1x256xf32, #tpu.memory_space<vmem>>, vector<1x256xf32>
    %81 = vector.broadcast %80 : vector<1x256xf32> to vector<8x256xf32>
    %82 = arith.mulf %75, %81 : vector<8x256xf32>
    %83 = arith.addf %79, %82 : vector<8x256xf32>
    %c0_71 = arith.constant 0 : index
    %c0_72 = arith.constant 0 : index
    %84 = vector.load %arg8[%c0_71, %c0_72] : memref<8x1xf32, #tpu.memory_space<vmem>>, vector<8x1xf32>
    %85 = vector.broadcast %84 : vector<8x1xf32> to vector<8x256xf32>
    %86 = arith.addf %83, %85 : vector<8x256xf32>
    %c0_73 = arith.constant 0 : index
    %c4_74 = arith.constant 4 : index
    %c0_75 = arith.constant 0 : index
    %87 = vector.load %arg11[%c0_73, %c4_74, %c0_75] : memref<1x12x256xf32, #tpu.memory_space<vmem>>, vector<1x8x256xf32>
    %88 = vector.shape_cast %87 : vector<1x8x256xf32> to vector<8x256xf32>
    %89 = vector.shape_cast %86 : vector<8x256xf32> to vector<1x8x256xf32>
    tpu.vector_store %arg11[%c0_73, %c4_74, %c0_75], %89 {strides = array<i32>} : memref<1x12x256xf32, #tpu.memory_space<vmem>>, vector<1x8x256xf32>,
    return
  }
  func.func @transform_0(%arg0: i32) -> (i32, i32, i32) {
    %c0_i32 = arith.constant 0 : i32
    %c0_i32_0 = arith.constant 0 : i32
    %c0_i32_1 = arith.constant 0 : i32
    return %arg0, %c0_i32, %c0_i32_0 : i32, i32, i32
  }
  func.func @transform_1(%arg0: i32) -> (i32, i32) {
    %c0_i32 = arith.constant 0 : i32
    %c0_i32_0 = arith.constant 0 : i32
    %c0_i32_1 = arith.constant 0 : i32
    return %c0_i32, %c0_i32_0 : i32, i32
  }
  func.func @transform_2(%arg0: i32) -> (i32, i32) {
    %c0_i32 = arith.constant 0 : i32
    %c0_i32_0 = arith.constant 0 : i32
    %c0_i32_1 = arith.constant 0 : i32
    return %c0_i32, %c0_i32_0 : i32, i32
  }
  func.func @transform_3(%arg0: i32) -> (i32, i32) {
    %c0_i32 = arith.constant 0 : i32
    %c0_i32_0 = arith.constant 0 : i32
    %c0_i32_1 = arith.constant 0 : i32
    return %c0_i32, %c0_i32_0 : i32, i32
  }
  func.func @transform_4(%arg0: i32) -> (i32, i32) {
    %c0_i32 = arith.constant 0 : i32
    %c0_i32_0 = arith.constant 0 : i32
    %c0_i32_1 = arith.constant 0 : i32
    return %c0_i32, %c0_i32_0 : i32, i32
  }
  func.func @transform_5(%arg0: i32) -> (i32, i32) {
    %c0_i32 = arith.constant 0 : i32
    %c0_i32_0 = arith.constant 0 : i32
    %c0_i32_1 = arith.constant 0 : i32
    return %c0_i32, %c0_i32_0 : i32, i32
  }
  func.func @transform_6(%arg0: i32) -> (i32, i32, i32) {
    %c0_i32 = arith.constant 0 : i32
    %c0_i32_0 = arith.constant 0 : i32
    %c0_i32_1 = arith.constant 0 : i32
    %c0_i32_2 = arith.constant 0 : i32
    return %c0_i32, %c0_i32_0, %c0_i32_1 : i32, i32, i32
  }
  func.func @transform_7(%arg0: i32) -> (i32, i32) {
    %c0_i32 = arith.constant 0 : i32
    %c0_i32_0 = arith.constant 0 : i32
    %c0_i32_1 = arith.constant 0 : i32
    return %c0_i32, %c0_i32_0 : i32, i32
  }
  func.func @transform_8(%arg0: i32) -> (i32, i32) {
    %c0_i32 = arith.constant 0 : i32
    %c0_i32_0 = arith.constant 0 : i32
    %c0_i32_1 = arith.constant 0 : i32
    return %c0_i32, %c0_i32_0 : i32, i32
  }
  func.func @transform_9(%arg0: i32) -> (i32, i32) {
    %c0_i32 = arith.constant 0 : i32
    %c0_i32_0 = arith.constant 0 : i32
    %c0_i32_1 = arith.constant 0 : i32
    return %c0_i32, %c0_i32_0 : i32, i32
  }
  func.func @transform_10(%arg0: i32) -> (i32, i32, i32) {
    %c0_i32 = arith.constant 0 : i32
    %c0_i32_0 = arith.constant 0 : i32
    %c0_i32_1 = arith.constant 0 : i32
    return %arg0, %c0_i32, %c0_i32_0 : i32, i32, i32
  }
}

</mosaic_0001>

<bundles_post_ra>
// kernel: dense_layer_forward.2
= control target key start
LH: loop header
LB: loop body
LE: loop exit
PB: predicated region body
PF: predicated region fallthrough
CT: control target
= control target key end

     0   :  { %s992_s30 = smov 0   ;;  %s994_s10 = smov 0   ;;  %s1167_s0 = inlined_call_operand.vmem [shape: f32[2,4,256], index: 0, kind: input, shape index: {}]   ;;  %s1168_s1 = inlined_call_operand.vmem [shape: f32[4,1], index: 1, kind: input, shape index: {}]   ;;  %s1169_s2 = inlined_call_operand.vmem [shape: f32[4,1], index: 2, kind: input, shape index: {}]   ;;  %s1170_s3 = inlined_call_operand.vmem [shape: f32[32,4], index: 3, kind: input, shape index: {}]   ;;  %s1171_s4 = inlined_call_operand.vmem [shape: f32[32,1], index: 4, kind: input, shape index: {}]   ;;  %s1172_s5 = inlined_call_operand.vmem [shape: f32[32,1], index: 5, kind: input, shape index: {}]   ;;  %s1173_s6 = inlined_call_operand.vmem [shape: f32[4,1], index: 6, kind: output, shape index: {0}]   ;;  %s1174_s7 = inlined_call_operand.vmem [shape: f32[4,1], index: 7, kind: output, shape index: {1}]   ;;  %s1175_s8 = inlined_call_operand.vmem [shape: f32[32,1], index: 8, kind: output, shape index: {2}]   ;;  %s1176_s9 = inlined_call_operand.vmem [shape: f32[32,1], index: 9, kind: output, shape index: {3}]  }
   0x1   :  { %s996_s11 = smov 0   ;;  %s998_s12 = smov 0  }
   0x2   :  { %s1000_s13 = smov 0  }
   0x3 LB: > { %s29_s14 = sadd.s32 1, %s925_s11  ;;  %s32_s15 = sadd.s32 1, %s929_s12  ;;  %s933_s13 = sphi %s1000_s13, %s20_s13   ;;  %s929_s12 = sphi %s998_s12, %s1180_s12   ;;  %s925_s11 = sphi %s996_s11, %s1179_s11   ;;  %s921_s10 = sphi %s994_s10, %s1178_s10   ;;  %s917_s30 = sphi %s992_s30, %s1177_s30  }
   0x4   : > { %p30_p0 = scmp.ge.s32.totalorder %s29_s14, 2  ;;  %p816_p1 = scmp.ge.s32.totalorder %s933_s13, 1 }
   0x5   : > { %p286_p2 = scmp.lt.s32.totalorder %s933_s13, 5 }
   0x6   : > { %s1182_s14 = smov (%p30_p0, %s29_s14), 0  ;;  %s1184_s15 = smov (!%p30_p0, %s32_s15), %s929_s12 }
   0x7   : > { %p287_p3 = pnand %p816_p1, %p286_p2  ;;  %p34_p4 = scmp.ge.s32.totalorder %s1184_s15, 2 }
   0x8   : > { %p317_p5 = scmp.lt.s32.totalorder (!%p287_p3), %s917_s30, 1  ;;  %p323_p6 = scmp.eq.s32.totalorder (!%p287_p3), %s921_s10, 0 }
   0x9   : > { %s1186_s15 = smov (%p34_p4, %s1184_s15), 0  ;;  %290 = sbr.rel (%p287_p3) target bundleno = 1309 (0x51d), region = 44 }
   0xa   : > { %p324_p7 = scmp.eq.s32.totalorder (!%p287_p3), %s917_s30, 0 }
   0xc   : > { %p325_p8 = pnand (!%p287_p3), %p324_p7, %p323_p6 }
   0xe   : > { %s318_s16 = scalar_select %p317_p5, %s917_s30, 1 }
   0xf   : > { %328 = sbr.rel (%p325_p8) target bundleno = 166 (0xa6), region = 48 }
  0x10   : > { %s831_s17 = sshll.u32 %s318_s16, 3 }
  0x11   : > { %s321_s20 = scalar_lea.vmem %s1167_s0, %s831_s17 }
  0x12   : > { %v1035_v0 = vld [vmem:[%s321_s20] sm:$0xff] }
  0x14   : > { %v330_v1 = vcombine.high %v1035_v0, %v1035_v0  ;;  %vm332_vm0 = vcmask 1043456   ;;  %vm339_vm1 = vcmask 3072   ;;  %v935_v5 = vmov 0.0  }
  0x15   : > { %v333_v2 = vsel %vm332_vm0, %v1035_v0, 0.0  ;;  %341 = vst.msk [vmem:[#allocation3] sm:$0xf] %vm339_vm1, %v935_v5  ;;  %342 = vst.msk [vmem:[#allocation4] sm:$0xf] %vm339_vm1, %v935_v5 }
  0x16   : > { %v334_v3 = vsel %vm332_vm0, %v330_v1, 0.0 }
  0x17   : > { %v335_v4 = vadd.f32 %v334_v3, %v333_v2 }
  0x19   : > { %336 = vadd.xlane.f32.xlu0 %v335_v4 }
  0xa2   : > { %v337_v6 = vpop.xlane.xlu0 %336 }
  0xa3   : > { %v338_v7 = vmul.f32 0.00390625, %v337_v6 }
  0xa5   : > { %340 = vst.msk [vmem:[#allocation2] sm:$0xf] %vm339_vm1, %v338_v7 }
  0xa6 PF: > { %p819_p9 = scmp.ne.s32.totalorder %s921_s10, 0 }
  0xa8   : > { %345 = sbr.rel (%p819_p9) target bundleno = 451 (0x1c3), region = 52 }
  0xad   : > { %v346_v8 = vld [vmem:[#allocation2] sm:$0xf]  ;;  %v936_v9 = vmov 0   ;;  %v937_v10 = vmov 839922192   ;;  %v354_v12 = vlaneseq  ;;  %vm364_vm2 = vcmask 1043456  }
  0xae   : > { %881 = vset.pattern.permute.xlu0 %v936_v9  ;;  %v352_v11 = vunpack.c.l.s4 %v937_v10  ;;  %v360_v28 = vld [vmem:[#allocation3] sm:$0xf]  ;;  %vm371_vm3 = vcmask 3072   ;;  %v373_v30 = vld [vmem:[#allocation4] sm:$0xf] }
  0xaf   : > { %349 = vperm.xlu0 %881, %v346_v8   ;;  %v355_v14 = vshrl.u32 %v354_v12, 7 }
  0xb0   : > { %v353_v13 = vunpack.c.0.s8 %v352_v11 }
  0xb2   : > { %v356_v15 = vsub.s32 %v353_v13, %v355_v14 }
 0x12a   : > { %v350_v16 = vpop.permute.xlu0 %349 }
 0x12b   : > { %v357_v17 = vrot.slane %v350_v16, %v356_v15 }
 0x12d   : > { %v359_v18 = vsub.f32 %v1035_v0, %v357_v17 }
 0x12f   : > { %v362_v19 = vcombine.high %v359_v18, %v359_v18  ;;  %v374_v20 = vmul.f32 %v359_v18, %v359_v18  ;;  %v365_v21 = vsel %vm364_vm2, %v359_v18, 0.0 }
 0x131   : > { %v366_v22 = vsel %vm364_vm2, %v362_v19, 0.0  ;;  %v376_v23 = vcombine.high %v374_v20, %v374_v20  ;;  %v378_v25 = vsel %vm364_vm2, %v374_v20, 0.0 }
 0x132   : > { %v367_v24 = vadd.f32 %v366_v22, %v365_v21 }
 0x133   : > { %v379_v26 = vsel %vm364_vm2, %v376_v23, 0.0 }
 0x134   : > { %368 = vadd.xlane.f32.xlu0 %v367_v24  ;;  %v380_v27 = vadd.f32 %v379_v26, %v378_v25 }
 0x136   : > { %381 = vadd.xlane.f32.xlu1 %v380_v27 }
 0x1bd   : > { %v369_v29 = vpop.xlane.xlu0 %368 }
 0x1be   : > { %v370_v31 = vadd.f32 %v369_v29, %v360_v28 }
 0x1bf   : > { %v382_v32 = vpop.xlane.xlu1 %381 }
 0x1c0   : > { %372 = vst.msk [vmem:[#allocation3] sm:$0xf] %vm371_vm3, %v370_v31  ;;  %v383_v33 = vadd.f32 %v382_v32, %v373_v30 }
 0x1c2   : > { %384 = vst.msk [vmem:[#allocation4] sm:$0xf] %vm371_vm3, %v383_v33 }
 0x1c3 PF: > { %p385_p10 = scmp.eq.s32.totalorder %s917_s30, 1 }
 0x1c5   : > { %p386_p11 = pnand %p385_p10, %p323_p6 }
 0x1c7   : > { %389 = sbr.rel (%p386_p11) target bundleno = 492 (0x1ec), region = 56 }
 0x1cc   : > { %v390_v34 = vld [vmem:[#allocation3] sm:$0xf]  ;;  %v392_v35 = vld [vmem:[#allocation4] sm:$0xf]  ;;  %v404_v42 = vld [vmem:[#allocation2] sm:$0xf] }
 0x1cd   : > { %v391_v36 = vmul.f32 0.001953125, %v390_v34  ;;  %v393_v37 = vmul.f32 0.001953125, %v392_v35  ;;  %v397_v43 = vld [vmem:[%s1168_s1] sm:$0xf]  ;;  %vm401_vm4 = vcmask 3072  }
 0x1ce   : > { %v403_v47 = vld [vmem:[%s1169_s2] sm:$0xf] }
 0x1cf   : > { %v394_v38 = vmul.f32 %v391_v36, %v391_v36  ;;  %v405_v44 = vadd.f32 %v404_v42, %v391_v36 }
 0x1d1   : > { %v395_v39 = vsub.f32 %v393_v37, %v394_v38 }
 0x1d3   : > { %v396_v40 = vmax.f32 %v395_v39, 0.0 }
 0x1d5   : > { %v398_v41 = vadd.f32 1e-05, %v396_v40 }
 0x1d7   : > { %882 = vrsqrt.f32 %v398_v41 }
 0x1e4   : > { %v883_v45 = vpop.eup %882 }
 0x1e5   : > { %v400_v46 = vmul.f32 %v883_v45, %v397_v43 }
 0x1e7   : > { %402 = vst.msk [vmem:[#allocation5] sm:$0xf] %vm401_vm4, %v400_v46  ;;  %v406_v48 = vmul.f32 %v405_v44, %v400_v46 }
 0x1e9   : > { %v407_v49 = vsub.f32 %v403_v47, %v406_v48 }
 0x1eb   : > { %408 = vst.msk [vmem:[#allocation6] sm:$0xf] %vm401_vm4, %v407_v49 }
 0x1ec PF: > { %p820_p12 = scmp.ne.s32.totalorder %s921_s10, 1 }
 0x1ed   : > { %p827_p13 = scmp.ne.s32.totalorder (!%p820_p12), %s917_s30, 0 }
 0x1ee   : > { %412 = sbr.rel (%p820_p12) target bundleno = 1309 (0x51d), region = 60 }
 0x1f3   : > { %v413_v50 = vld [vmem:[#allocation5] sm:$0xf]  ;;  %v938_v51 = vmov 0   ;;  %v427_v52 = vld [vmem:[#allocation6] sm:$0xf]  ;;  %v939_v53 = vmov 0.0   ;;  %v421_v56 = vlaneseq }
 0x1f4   : > { %884 = vset.pattern.permute.xlu0 %v938_v51  ;;  %530 = vmatprep.mubr.f32.mxu0 %v939_v53  ;;  %v940_v54 = vmov 839922192   ;;  %vm461_vm5 = vcmask 1043456   ;;  %v442_v5 = vld [vmem:[%s1170_s3] sm:$0xff]  ;;  %vm448_vm6 = vcmask 31744   ;;  %v444_v6 = vld [vmem:[%s1170_s3 + $0x10] sm:$0xff] }
 0x1f5   : > { %416 = vperm.xlu0 %884, %v413_v50   ;;  %542 = vmatprep.mubr.f32.mxu1 %v939_v53  ;;  %v419_v55 = vunpack.c.l.s4 %v940_v54  ;;  %v422_v58 = vshrl.u32 %v421_v56, 7  ;;  %v445_v7 = vld [vmem:[%s1170_s3 + $0x18] sm:$0xff] }
 0x1f7   : > { %v420_v57 = vunpack.c.0.s8 %v419_v55 }
 0x1f9   : > { %430 = vperm.xlu0 %884, %v427_v52   ;;  %v423_v59 = vsub.s32 %v420_v57, %v422_v58 }
 0x270   : > { %v417_v60 = vpop.permute.xlu0 %416 }
 0x271   : > { %v424_v61 = vrot.slane %v417_v60, %v423_v59 }
 0x273   : > { %v426_v63 = vmul.f32 %v424_v61, %v1035_v0  ;;  %v443_v0 = vld [vmem:[%s1170_s3 + $0x8] sm:$0xff] }
 0x274   : > { %v431_v62 = vpop.permute.xlu0 %430 }
 0x275   : > { %v438_v1 = vrot.slane %v431_v62, %v423_v59 }
 0x277   : > { %v440_v2 = vadd.f32 %v438_v1, %v426_v63 }
 0x279   : > { %v441_v3 = vmax.f32 %v440_v2, 0.0 }
 0x27b   : > { %v447_v4 = vcombine.high %v441_v3, %v441_v3 }
 0x27d   : > { %821 = vmatprep.subr.msk.mxu0 %vm461_vm5, %v447_v4  ;;  %832 = vmatprep.subr.msk.mxu1 %vm461_vm5, %v447_v4 }
 0x27e   : > { %822 = vmatpush1.msk.msra.mxu0 %vm461_vm5, %v441_v3  ;;  %833 = vmatpush1.msk.msra.mxu1 %vm461_vm5, %v441_v3 }
 0x27f   : > { %823 = vmatmul.mubr.msk.f32.vlgmr.msra.gmra.mxu0 %vm448_vm6, %v442_v5  ;;  %825 = vmatmul.mubr.msk.f32.vlgmr.msra.gmra.mxu1 %vm448_vm6, %v444_v6 }
 0x280   : > { %536 = vmatprep.mubr.f32.mxu0 %v939_v53  ;;  %548 = vmatprep.mubr.f32.mxu1 %v939_v53 }
 0x283   : > { %824 = vmatmul.mubr.msk.f32.gmra.mxu0 %vm448_vm6, %v443_v0  ;;  %826 = vmatmul.mubr.msk.f32.gmra.mxu1 %vm448_vm6, %v445_v7 }
 0x33f   : > { %v532_v8 = vpop.f32.mrf.mxu0  ;;  %v544_v9 = vpop.f32.mrf.mxu1 }
 0x341   : > { %v534_v10 = vpop.f32.mrf.mxu0  ;;  %v546_v11 = vpop.f32.mrf.mxu1  ;;  %557 = sbr.rel (%p827_p13) target bundleno = 985 (0x3d9), region = 64 }
 0x343   : > { %v538_v12 = vpop.f32.mrf.mxu0  ;;  %v550_v13 = vpop.f32.mrf.mxu1 }
 0x345   : > { %v540_v14 = vpop.f32.mrf.mxu0  ;;  %v552_v15 = vpop.f32.mrf.mxu1 }
 0x346   : > { %v564_v16 = vadd.f32 %v546_v11, %v544_v9  ;;  %v558_v17 = vadd.f32 %v534_v10, %v532_v8  ;;  %vm574_vm7 = vcmask 7168   ;;  %v567_v18 = vadd.f32 %v552_v15, %v550_v13 }
 0x347   : > { %v561_v19 = vadd.f32 %v540_v14, %v538_v12  ;;  %v941_v20 = vmov 0.0  }
 0x348   : > { %565 = vadd.xlane.f32.xlu1 %v564_v16  ;;  %559 = vadd.xlane.f32.xlu0 %v558_v17  ;;  %579 = vst.msk [vmem:[#allocation8] sm:$0xff] %vm574_vm7, %v941_v20  ;;  %580 = vst.msk [vmem:[#allocation8 + $0x8] sm:$0xff] %vm574_vm7, %v941_v20 }
 0x349   : > { %581 = vst.msk [vmem:[#allocation8 + $0x10] sm:$0xff] %vm574_vm7, %v941_v20  ;;  %582 = vst.msk [vmem:[#allocation8 + $0x18] sm:$0xff] %vm574_vm7, %v941_v20 }
 0x34a   : > { %583 = vst.msk [vmem:[#allocation9] sm:$0xff] %vm574_vm7, %v941_v20  ;;  %584 = vst.msk [vmem:[#allocation9 + $0x8] sm:$0xff] %vm574_vm7, %v941_v20 }
 0x34b   : > { %585 = vst.msk [vmem:[#allocation9 + $0x10] sm:$0xff] %vm574_vm7, %v941_v20  ;;  %586 = vst.msk [vmem:[#allocation9 + $0x18] sm:$0xff] %vm574_vm7, %v941_v20 }
 0x34c   : > { %568 = vadd.xlane.f32.xlu1 %v567_v18  ;;  %562 = vadd.xlane.f32.xlu0 %v561_v19 }
 0x3d1   : > { %v566_v21 = vpop.xlane.xlu1 %565  ;;  %v560_v22 = vpop.xlane.xlu0 %559 }
 0x3d2   : > { %v572_v23 = vmul.f32 0.00390625, %v566_v21  ;;  %v570_v24 = vmul.f32 0.00390625, %v560_v22 }
 0x3d4   : > { %577 = vst.msk [vmem:[#allocation7 + $0x10] sm:$0xff] %vm574_vm7, %v572_v23  ;;  %575 = vst.msk [vmem:[#allocation7] sm:$0xff] %vm574_vm7, %v570_v24 }
 0x3d5   : > { %v569_v25 = vpop.xlane.xlu1 %568  ;;  %v563_v26 = vpop.xlane.xlu0 %562 }
 0x3d6   : > { %v573_v27 = vmul.f32 0.00390625, %v569_v25  ;;  %v571_v28 = vmul.f32 0.00390625, %v563_v26 }
 0x3d8   : > { %578 = vst.msk [vmem:[#allocation7 + $0x18] sm:$0xff] %vm574_vm7, %v573_v27  ;;  %576 = vst.msk [vmem:[#allocation7 + $0x8] sm:$0xff] %vm574_vm7, %v571_v28 }
 0x3d9 PF: > { %886 = vset.pattern.permute.xlu1 %v938_v51  ;;  %885 = vset.pattern.permute.xlu0 %v938_v51  ;;  %v619_v61 = vld [vmem:[#allocation8] sm:$0xff]  ;;  %vm639_vm8 = vcmask 7168   ;;  %v620_v1 = vld [vmem:[#allocation8 + $0x8] sm:$0xff]  ;;  %v621_v2 = vld [vmem:[#allocation8 + $0x10] sm:$0xff]  ;;  %p828_p0 = scmp.ne.s32.totalorder %s917_s30, 1 }
 0x3da   : > { %v644_v0 = vld [vmem:[#allocation9] sm:$0xff]  ;;  %v622_v7 = vld [vmem:[#allocation8 + $0x18] sm:$0xff] }
 0x3db   : > { %v589_v29 = vld [vmem:[#allocation7 + $0x10] sm:$0xff]  ;;  %v587_v30 = vld [vmem:[#allocation7] sm:$0xff]  ;;  %v647_v18 = vld [vmem:[#allocation9 + $0x18] sm:$0xff] }
 0x3dc   : > { %603 = vperm.xlu1 %886, %v589_v29   ;;  %593 = vperm.xlu0 %885, %v587_v30  }
 0x3df   : > { %v590_v31 = vld [vmem:[#allocation7 + $0x18] sm:$0xff]  ;;  %v588_v32 = vld [vmem:[#allocation7 + $0x8] sm:$0xff] }
 0x3e0   : > { %608 = vperm.xlu1 %886, %v590_v31   ;;  %598 = vperm.xlu0 %885, %v588_v32  }
 0x457   : > { %v604_v33 = vpop.permute.xlu1 %603  ;;  %v594_v34 = vpop.permute.xlu0 %593 }
 0x458   : > { %v615_v35 = vsub.f32 %v544_v9, %v604_v33  ;;  %v616_v36 = vsub.f32 %v546_v11, %v604_v33  ;;  %v611_v37 = vsub.f32 %v532_v8, %v594_v34  ;;  %v612_v38 = vsub.f32 %v534_v10, %v594_v34 }
 0x45a   : > { %v623_v39 = vadd.f32 %v612_v38, %v611_v37  ;;  %v629_v44 = vadd.f32 %v616_v36, %v615_v35  ;;  %v648_v45 = vmul.f32 %v611_v37, %v611_v37  ;;  %v649_v49 = vmul.f32 %v612_v38, %v612_v38 }
 0x45b   : > { %v609_v40 = vpop.permute.xlu1 %608  ;;  %v599_v41 = vpop.permute.xlu0 %598  ;;  %v652_v50 = vmul.f32 %v615_v35, %v615_v35  ;;  %v653_v51 = vmul.f32 %v616_v36, %v616_v36 }
 0x45c   : > { %v613_v42 = vsub.f32 %v538_v12, %v599_v41  ;;  %v614_v43 = vsub.f32 %v540_v14, %v599_v41  ;;  %624 = vadd.xlane.f32.xlu0 %v623_v39  ;;  %v617_v46 = vsub.f32 %v550_v13, %v609_v40  ;;  %v618_v47 = vsub.f32 %v552_v15, %v609_v40  ;;  %v646_v12 = vld [vmem:[#allocation9 + $0x10] sm:$0xff]  ;;  %v645_v13 = vld [vmem:[#allocation9 + $0x8] sm:$0xff] }
 0x45d   : > { %v656_v53 = vadd.f32 %v649_v49, %v648_v45  ;;  %v662_v57 = vadd.f32 %v653_v51, %v652_v50 }
 0x45e   : > { %v626_v48 = vadd.f32 %v614_v43, %v613_v42  ;;  %v632_v52 = vadd.f32 %v618_v47, %v617_v46  ;;  %v650_v54 = vmul.f32 %v613_v42, %v613_v42  ;;  %v651_v55 = vmul.f32 %v614_v43, %v614_v43 }
 0x45f   : > { %v654_v58 = vmul.f32 %v617_v46, %v617_v46  ;;  %v655_v59 = vmul.f32 %v618_v47, %v618_v47 }
 0x460   : > { %630 = vadd.xlane.f32.xlu0 %v629_v44  ;;  %627 = vadd.xlane.f32.xlu1 %v626_v48  ;;  %v659_v56 = vadd.f32 %v651_v55, %v650_v54 }
 0x461   : > { %v665_v60 = vadd.f32 %v655_v59, %v654_v58 }
 0x464   : > { %633 = vadd.xlane.f32.xlu0 %v632_v52  ;;  %657 = vadd.xlane.f32.xlu1 %v656_v53 }
 0x468   : > { %660 = vadd.xlane.f32.xlu0 %v659_v56  ;;  %663 = vadd.xlane.f32.xlu1 %v662_v57 }
 0x46c   : > { %666 = vadd.xlane.f32.xlu0 %v665_v60 }
 0x4e5   : > { %v625_v62 = vpop.xlane.xlu0 %624 }
 0x4e6   : > { %v635_v63 = vadd.f32 %v625_v62, %v619_v61 }
 0x4e8   : > { %640 = vst.msk [vmem:[#allocation8] sm:$0xff] %vm639_vm8, %v635_v63 }
 0x4e9   : > { %v628_v3 = vpop.xlane.xlu1 %627  ;;  %v631_v4 = vpop.xlane.xlu0 %630 }
 0x4ea   : > { %v636_v5 = vadd.f32 %v628_v3, %v620_v1  ;;  %v637_v6 = vadd.f32 %v631_v4, %v621_v2 }
 0x4ec   : > { %641 = vst.msk [vmem:[#allocation8 + $0x8] sm:$0xff] %vm639_vm8, %v636_v5  ;;  %642 = vst.msk [vmem:[#allocation8 + $0x10] sm:$0xff] %vm639_vm8, %v637_v6 }
 0x4ed   : > { %v658_v8 = vpop.xlane.xlu1 %657  ;;  %v634_v9 = vpop.xlane.xlu0 %633 }
 0x4ee   : > { %v668_v10 = vadd.f32 %v658_v8, %v644_v0  ;;  %v638_v11 = vadd.f32 %v634_v9, %v622_v7 }
 0x4f0   : > { %672 = vst.msk [vmem:[#allocation9] sm:$0xff] %vm639_vm8, %v668_v10  ;;  %643 = vst.msk [vmem:[#allocation8 + $0x18] sm:$0xff] %vm639_vm8, %v638_v11 }
 0x4f1   : > { %v664_v14 = vpop.xlane.xlu1 %663  ;;  %v661_v15 = vpop.xlane.xlu0 %660 }
 0x4f2   : > { %v670_v16 = vadd.f32 %v664_v14, %v646_v12  ;;  %v669_v17 = vadd.f32 %v661_v15, %v645_v13 }
 0x4f4   : > { %674 = vst.msk [vmem:[#allocation9 + $0x10] sm:$0xff] %vm639_vm8, %v670_v16  ;;  %673 = vst.msk [vmem:[#allocation9 + $0x8] sm:$0xff] %vm639_vm8, %v669_v17  ;;  %678 = sbr.rel (%p828_p0) target bundleno = 1309 (0x51d), region = 68 }
 0x4f5   : > { %v667_v19 = vpop.xlane.xlu0 %666 }
 0x4f6   : > { %v671_v20 = vadd.f32 %v667_v19, %v647_v18 }
 0x4f8   : > { %675 = vst.msk [vmem:[#allocation9 + $0x18] sm:$0xff] %vm639_vm8, %v671_v20 }
 0x4f9   : > { %v723_v21 = vld [vmem:[#allocation5] sm:$0xf]  ;;  %vm724_vm9 = vcmask 3072   ;;  %v726_v22 = vld [vmem:[#allocation6] sm:$0xf]  ;;  %v679_v23 = vld [vmem:[#allocation8] sm:$0xff] }
 0x4fa   : > { %725 = vst.msk [vmem:[%s1173_s6] sm:$0xf] %vm724_vm9, %v723_v21  ;;  %727 = vst.msk [vmem:[%s1174_s7] sm:$0xf] %vm724_vm9, %v726_v22  ;;  %v683_v24 = vmul.f32 0.001953125, %v679_v23  ;;  %v687_v25 = vld [vmem:[#allocation9] sm:$0xff] }
 0x4fb   : > { %v680_v26 = vld [vmem:[#allocation8 + $0x8] sm:$0xff]  ;;  %v691_v27 = vmul.f32 0.001953125, %v687_v25  ;;  %v681_v30 = vld [vmem:[#allocation8 + $0x10] sm:$0xff]  ;;  %v682_v35 = vld [vmem:[#allocation8 + $0x18] sm:$0xff] }
 0x4fc   : > { %v684_v28 = vmul.f32 0.001953125, %v680_v26  ;;  %v688_v29 = vld [vmem:[#allocation9 + $0x8] sm:$0xff]  ;;  %v695_v31 = vmul.f32 %v683_v24, %v683_v24  ;;  %v685_v33 = vmul.f32 0.001953125, %v681_v30  ;;  %v689_v34 = vld [vmem:[#allocation9 + $0x10] sm:$0xff]  ;;  %v686_v38 = vmul.f32 0.001953125, %v682_v35  ;;  %v736_v55 = vld [vmem:[#allocation7] sm:$0xff] }
 0x4fd   : > { %v692_v32 = vmul.f32 0.001953125, %v688_v29  ;;  %v693_v37 = vmul.f32 0.001953125, %v689_v34  ;;  %v737_v56 = vld [vmem:[#allocation7 + $0x8] sm:$0xff]  ;;  %v738_v58 = vld [vmem:[#allocation7 + $0x10] sm:$0xff]  ;;  %v740_v60 = vadd.f32 %v736_v55, %v683_v24  ;;  %v739_v61 = vld [vmem:[#allocation7 + $0x18] sm:$0xff] }
 0x4fe   : > { %v696_v36 = vmul.f32 %v684_v28, %v684_v28  ;;  %v699_v40 = vsub.f32 %v691_v27, %v695_v31  ;;  %v697_v41 = vmul.f32 %v685_v33, %v685_v33  ;;  %v698_v44 = vmul.f32 %v686_v38, %v686_v38  ;;  %v707_v57 = vld [vmem:[%s1171_s4] sm:$0xff]  ;;  %v708_v59 = vld [vmem:[%s1171_s4 + $0x8] sm:$0xff]  ;;  %v709_v63 = vld [vmem:[%s1171_s4 + $0x10] sm:$0xff] }
 0x4ff   : > { %v690_v39 = vld [vmem:[#allocation9 + $0x18] sm:$0xff]  ;;  %v741_v1 = vadd.f32 %v737_v56, %v684_v28  ;;  %v710_v4 = vld [vmem:[%s1171_s4 + $0x18] sm:$0xff]  ;;  %v742_v5 = vadd.f32 %v738_v58, %v685_v33  ;;  %v732_v7 = vld [vmem:[%s1172_s5] sm:$0xff]  ;;  %v743_v8 = vadd.f32 %v739_v61, %v686_v38 }
 0x500   : > { %v694_v42 = vmul.f32 0.001953125, %v690_v39  ;;  %v700_v43 = vsub.f32 %v692_v32, %v696_v36  ;;  %v703_v45 = vmax.f32 %v699_v40, 0.0  ;;  %v701_v46 = vsub.f32 %v693_v37, %v697_v41  ;;  %v733_v12 = vld [vmem:[%s1172_s5 + $0x8] sm:$0xff]  ;;  %v734_v15 = vld [vmem:[%s1172_s5 + $0x10] sm:$0xff]  ;;  %v735_v18 = vld [vmem:[%s1172_s5 + $0x18] sm:$0xff] }
 0x502   : > { %v704_v47 = vmax.f32 %v700_v43, 0.0  ;;  %v702_v48 = vsub.f32 %v694_v42, %v698_v44  ;;  %v711_v49 = vadd.f32 1e-05, %v703_v45  ;;  %v705_v50 = vmax.f32 %v701_v46, 0.0 }
 0x504   : > { %v712_v51 = vadd.f32 1e-05, %v704_v47  ;;  %v706_v52 = vmax.f32 %v702_v48, 0.0  ;;  %887 = vrsqrt.f32 %v711_v49  ;;  %v713_v53 = vadd.f32 1e-05, %v705_v50 }
 0x506   : > { %889 = vrsqrt.f32 %v712_v51  ;;  %v714_v54 = vadd.f32 1e-05, %v706_v52 }
 0x507   : > { %891 = vrsqrt.f32 %v713_v53 }
 0x508   : > { %893 = vrsqrt.f32 %v714_v54 }
 0x511   : > { %v888_v62 = vpop.eup %887 }
 0x512   : > { %v719_v3 = vmul.f32 %v888_v62, %v707_v57 }
 0x513   : > { %v890_v2 = vpop.eup %889 }
 0x514   : > { %v892_v6 = vpop.eup %891  ;;  %v720_v0 = vmul.f32 %v890_v2, %v708_v59  ;;  %728 = vst.msk [vmem:[%s1175_s8] sm:$0xff] %vm639_vm8, %v719_v3  ;;  %v744_v11 = vmul.f32 %v740_v60, %v719_v3 }
 0x515   : > { %v894_v9 = vpop.eup %893  ;;  %v721_v10 = vmul.f32 %v892_v6, %v709_v63 }
 0x516   : > { %729 = vst.msk [vmem:[%s1175_s8 + $0x8] sm:$0xff] %vm639_vm8, %v720_v0  ;;  %v722_v13 = vmul.f32 %v894_v9, %v710_v4  ;;  %v745_v14 = vmul.f32 %v741_v1, %v720_v0  ;;  %v748_v16 = vsub.f32 %v732_v7, %v744_v11 }
 0x517   : > { %730 = vst.msk [vmem:[%s1175_s8 + $0x10] sm:$0xff] %vm639_vm8, %v721_v10  ;;  %v746_v17 = vmul.f32 %v742_v5, %v721_v10 }
 0x518   : > { %731 = vst.msk [vmem:[%s1175_s8 + $0x18] sm:$0xff] %vm639_vm8, %v722_v13  ;;  %v749_v19 = vsub.f32 %v733_v12, %v745_v14  ;;  %v747_v20 = vmul.f32 %v743_v8, %v722_v13  ;;  %752 = vst.msk [vmem:[%s1176_s9] sm:$0xff] %vm639_vm8, %v748_v16 }
 0x519   : > { %v750_v21 = vsub.f32 %v734_v15, %v746_v17 }
 0x51a   : > { %753 = vst.msk [vmem:[%s1176_s9 + $0x8] sm:$0xff] %vm639_vm8, %v749_v19  ;;  %v751_v22 = vsub.f32 %v735_v18, %v747_v20 }
 0x51b   : > { %754 = vst.msk [vmem:[%s1176_s9 + $0x10] sm:$0xff] %vm639_vm8, %v750_v21 }
 0x51c   : > { %755 = vst.msk [vmem:[%s1176_s9 + $0x18] sm:$0xff] %vm639_vm8, %v751_v22 }
 0x51d PF: > { %s20_s13 = sadd.s32 1, %s933_s13   ;;  %s1177_s30 = smov %s925_s11 }
 0x51e   : > { %p17_p1 = scmp.ge.s32.totalorder %s20_s13, 6   ;;  %s1178_s10 = smov %s929_s12 }
 0x51f   : > { %s1179_s11 = smov %s1182_s14  ;;  %s1180_s12 = smov %s1186_s15 }
 0x520   :  { %19 = sbr.rel (!%p17_p1) target bundleno = 3 (0x3), region = 118 }

// kernel: dense_layer_forward.3
= control target key start
LH: loop header
LB: loop body
LE: loop exit
PB: predicated region body
PF: predicated region fallthrough
CT: control target
= control target key end

     0   :  { %s1924_s13 = smov 0   ;;  %s2481_s0 = inlined_call_operand.vmem [shape: f32[2,4,256], index: 0, kind: input, shape index: {}]   ;;  %s2482_s1 = inlined_call_operand.vmem [shape: f32[4,1], index: 1, kind: input, shape index: {}]   ;;  %s2483_s2 = inlined_call_operand.vmem [shape: f32[4,1], index: 2, kind: input, shape index: {}]   ;;  %s2484_s3 = inlined_call_operand.vmem [shape: f32[32,4], index: 3, kind: input, shape index: {}]   ;;  %s2485_s4 = inlined_call_operand.vmem [shape: f32[32,1], index: 4, kind: input, shape index: {}]   ;;  %s2486_s5 = inlined_call_operand.vmem [shape: f32[32,1], index: 5, kind: input, shape index: {}]   ;;  %s2487_s6 = inlined_call_operand.vmem [shape: f32[9,8,32], index: 6, kind: input, shape index: {}]   ;;  %s2488_s7 = inlined_call_operand.vmem [shape: f32[8,1], index: 7, kind: input, shape index: {}]   ;;  %s2489_s8 = inlined_call_operand.vmem [shape: f32[1,256], index: 8, kind: input, shape index: {}]   ;;  %s2490_s9 = inlined_call_operand.vmem [shape: f32[1,256], index: 9, kind: input, shape index: {}]   ;;  %s2491_s10 = inlined_call_operand.vmem [shape: f32[2,12,256], index: 10, kind: output, shape index: {}]  }
   0x1 LB: > { %s1790_s14 = sadd.s32 4294967295, %s1855_s13   ;;  %p1794_p0 = scmp.ge.s32.totalorder %s1855_s13, 1  ;;  %s1855_s13 = sphi %s1924_s13, %s20_s13  }
   0x2   : > { %p312_p1 = scmp.lt.s32.totalorder %s1855_s13, 3 }
   0x4   : > { %p313_p2 = pnand %p1794_p0, %p312_p1 }
   0x6   : > { %316 = sbr.rel (%p313_p2) target bundleno = 990 (0x3de), region = 60 }
   0xb   : > { %v366_v0 = vld [vmem:[%s2482_s1] sm:$0xf]  ;;  %v1857_v1 = vmov 0   ;;  %p350_p3 = scmp.lt.s32.totalorder %s1790_s14, 1  ;;  %v543_v3 = vld [vmem:[%s2486_s5 + $0x18] sm:$0xff]  ;;  %v542_v6 = vld [vmem:[%s2486_s5 + $0x10] sm:$0xff]  ;;  %v374_v16 = vlaneseq }
   0xc   : > { %1846 = vset.pattern.permute.xlu0 %v1857_v1  ;;  %1847 = vset.pattern.permute.xlu1 %v1857_v1  ;;  %v380_v2 = vld [vmem:[%s2483_s2] sm:$0xf]  ;;  %v2492_v7 = vmov 0.0   ;;  %v541_v8 = vld [vmem:[%s2486_s5 + $0x8] sm:$0xff]  ;;  %v511_v9 = vld [vmem:[%s2485_s4 + $0x18] sm:$0xff]  ;;  %vm414_vm0 = vcmask 1043456  }
   0xd   : > { %369 = vperm.xlu0 %1846, %v366_v0   ;;  %s2518_s14 = smov (!%p350_p3, %s1790_s14), 1  ;;  %483 = vmatprep.mubr.f32.mxu0 %v2492_v7  ;;  %v510_v10 = vld [vmem:[%s2485_s4 + $0x10] sm:$0xff]  ;;  %v509_v11 = vld [vmem:[%s2485_s4 + $0x8] sm:$0xff]  ;;  %v508_v12 = vld [vmem:[%s2485_s4] sm:$0xff]  ;;  %v1859_v14 = vmov 839922192  }
   0xe   : > { %s1824_s19 = sshll.u32 %s2518_s14, 3  ;;  %s1825_s20 = sshll.u32 %s2518_s14, 5  ;;  %783 = vmatprep.mubr.f32.mxu1 %v2492_v7  ;;  %529 = vperm.xlu1 %1847, %v511_v9   ;;  %v540_v13 = vld [vmem:[%s2486_s5] sm:$0xff]  ;;  %v372_v15 = vunpack.c.l.s4 %v1859_v14  ;;  %v1974_v18 = vshrl.u32 %v374_v16, 7  ;;  %vm401_vm1 = vcmask 31744   ;;  %v396_v29 = vld [vmem:[%s2484_s3 + $0x8] sm:$0xff] }
   0xf   : > { %s354_s23 = scalar_lea.vmem %s2481_s0, %s1824_s19  ;;  %s1947_s28 = scalar_lea.vmem %s2491_s10, %s1825_s20  ;;  %v395_v28 = vld [vmem:[%s2484_s3] sm:$0xff]  ;;  %v397_v30 = vld [vmem:[%s2484_s3 + $0x10] sm:$0xff]  ;;  %v398_v31 = vld [vmem:[%s2484_s3 + $0x18] sm:$0xff]  ;;  %vm580_vm2 = vcmask 138240   ;;  %vm585_vm3 = vcmask 277640   ;;  %vm630_vm4 = vcmask 1047688  }
  0x10   : > { %v360_v4 = vld [vmem:[%s354_s23] sm:$0xff]  ;;  %v373_v17 = vunpack.c.0.s8 %v372_v15  ;;  %2496 = vst [vmem:[#allocation3_spill] sm:$0xff] %v1974_v18  ;;  %581 = vst.msk [vmem:[#allocation2] sm:$0xff] %vm580_vm2, %v2492_v7  ;;  %s1860_s14 = smov 17   ;;  %s1861_s15 = smov 127   ;;  %vm1005_vm5 = vcmask 1039360  }
  0x11   : > { %383 = vperm.xlu0 %1846, %v380_v2   ;;  %v362_v5 = vcombine.high %v360_v4, %v360_v4  ;;  %364 = vst [vmem:[%s1947_s28] sm:$0xf] %v360_v4  ;;  %582 = vst.msk [vmem:[#allocation2 + $0x18] sm:$0xff] %vm580_vm2, %v2492_v7  ;;  %s1862_s16 = smov 112   ;;  %s1863_s17 = smov 126   ;;  %vm1122_vm6 = vcmask 900096   ;;  %vm1237_vm7 = vcmask 1031168  }
  0x12   : > { %524 = vperm.xlu1 %1847, %v510_v10   ;;  %v376_v19 = vsub.s32 %v373_v17, %v1974_v18  ;;  %583 = vst.msk [vmem:[#allocation2 + $0x30] sm:$0xff] %vm580_vm2, %v2492_v7  ;;  %584 = vst.msk [vmem:[#allocation2 + $0x48] sm:$0xff] %vm580_vm2, %v2492_v7  ;;  %s1864_s18 = smov 111   ;;  %s1865_s19 = smov 110   ;;  %vm1354_vm8 = vcmask 785408   ;;  %vm698_vm9 = vcmask 916480  }
  0x13   : > { %365 = vst [vmem:[%s1947_s28 + $0x8] sm:$0xf] %v362_v5  ;;  %586 = vst.msk [vmem:[#allocation2 + $0x10] sm:$0xff] %vm585_vm3, %v2492_v7  ;;  %s1866_s20 = smov 96   ;;  %s1867_s21 = smov 95   ;;  %vm890_vm10 = vcmask 908288  }
  0x14   : > { %587 = vst.msk [vmem:[#allocation2 + $0x28] sm:$0xff] %vm585_vm3, %v2492_v7  ;;  %588 = vst.msk [vmem:[#allocation2 + $0x40] sm:$0xff] %vm585_vm3, %v2492_v7  ;;  %s1868_s22 = smov 94   ;;  %vm1473_vm11 = vcmask 777216   ;;  %vm1592_vm12 = vcmask 769024   ;;  %vm715_vm13 = vcmask 261120  }
  0x15   : > { %561 = vperm.xlu0 %1846, %v543_v3   ;;  %589 = vst.msk [vmem:[#allocation2 + $0x58] sm:$0xff] %vm585_vm3, %v2492_v7 }
  0x16   : > { %519 = vperm.xlu1 %1847, %v509_v11  }
  0x19   : > { %556 = vperm.xlu0 %1846, %v542_v6  }
  0x1a   : > { %514 = vperm.xlu1 %1847, %v508_v12  }
  0x1d   : > { %551 = vperm.xlu0 %1846, %v541_v8  }
  0x1e   : > { %546 = vperm.xlu1 %1847, %v540_v13  }
  0x88   : > { %v370_v20 = vpop.permute.xlu0 %369 }
  0x89   : > { %v377_v21 = vrot.slane %v370_v20, %v376_v19  ;;  %v530_v32 = vpop.permute.xlu1 %529 }
  0x8b   : > { %v379_v23 = vmul.f32 %v377_v21, %v360_v4 }
  0x8c   : > { %v384_v22 = vpop.permute.xlu0 %383 }
  0x8d   : > { %v391_v24 = vrot.slane %v384_v22, %v376_v19  ;;  %v525_v33 = vpop.permute.xlu1 %524 }
  0x8f   : > { %v393_v25 = vadd.f32 %v391_v24, %v379_v23 }
  0x90   : > { %v562_v35 = vpop.permute.xlu0 %561 }
  0x91   : > { %v394_v26 = vmax.f32 %v393_v25, 0.0  ;;  %v520_v34 = vpop.permute.xlu1 %519 }
  0x93   : > { %v400_v27 = vcombine.high %v394_v26, %v394_v26 }
  0x94   : > { %v557_v37 = vpop.permute.xlu0 %556 }
  0x95   : > { %1799 = vmatprep.subr.msk.mxu0 %vm414_vm0, %v400_v27  ;;  %v515_v36 = vpop.permute.xlu1 %514 }
  0x96   : > { %1800 = vmatpush1.msk.msra.mxu0 %vm414_vm0, %v394_v26 }
  0x97   : > { %1801 = vmatmul.mubr.msk.f32.vlgmr.msra.gmra.mxu0 %vm401_vm1, %v395_v28 }
  0x98   : > { %489 = vmatprep.mubr.f32.mxu0 %v2492_v7  ;;  %v552_v48 = vpop.permute.xlu0 %551 }
  0x99   : > { %v547_v40 = vpop.permute.xlu1 %546 }
  0x9b   : > { %1802 = vmatmul.mubr.msk.f32.gmra.mxu0 %vm401_vm1, %v396_v29 }
  0x9c   : > { %495 = vmatprep.mubr.f32.mxu0 %v2492_v7 }
  0x9f   : > { %1803 = vmatmul.mubr.msk.f32.gmra.mxu0 %vm401_vm1, %v397_v30 }
  0xa0   : > { %501 = vmatprep.mubr.f32.mxu0 %v2492_v7 }
  0xa3   : > { %1804 = vmatmul.mubr.msk.f32.gmra.mxu0 %vm401_vm1, %v398_v31 }
  0xa4   : > { %974 = vmatprep.mubr.f32.mxu0 %v2492_v7 }
 0x157   : > { %v485_v38 = vpop.f32.mrf.mxu0 }
 0x158   : > { %v532_v39 = vmul.f32 %v515_v36, %v485_v38 }
 0x159   : > { %v487_v41 = vpop.f32.mrf.mxu0 }
 0x15a   : > { %v564_v42 = vadd.f32 %v547_v40, %v532_v39  ;;  %v533_v43 = vmul.f32 %v515_v36, %v487_v41 }
 0x15b   : > { %v491_v44 = vpop.f32.mrf.mxu0 }
 0x15c   : > { %v572_v45 = vmax.f32 %v564_v42, 0.0  ;;  %v565_v46 = vadd.f32 %v547_v40, %v533_v43  ;;  %v534_v47 = vmul.f32 %v520_v34, %v491_v44 }
 0x15d   : > { %v493_v49 = vpop.f32.mrf.mxu0 }
 0x15e   : > { %v573_v50 = vmax.f32 %v565_v46, 0.0  ;;  %v566_v51 = vadd.f32 %v552_v48, %v534_v47  ;;  %v535_v52 = vmul.f32 %v520_v34, %v493_v49  ;;  %598 = vrot.lane.b32.xlu0 %v572_v45, %s1860_s14 }
 0x15f   : > { %v497_v53 = vpop.f32.mrf.mxu0 }
 0x160   : > { %v574_v54 = vmax.f32 %v566_v51, 0.0  ;;  %v567_v55 = vadd.f32 %v552_v48, %v535_v52  ;;  %v536_v56 = vmul.f32 %v525_v33, %v497_v53  ;;  %600 = vrot.lane.b32.xlu1 %v573_v50, %s1860_s14 }
 0x161   : > { %v499_v57 = vpop.f32.mrf.mxu0 }
 0x162   : > { %v575_v58 = vmax.f32 %v567_v55, 0.0  ;;  %v568_v59 = vadd.f32 %v557_v37, %v536_v56  ;;  %v537_v60 = vmul.f32 %v525_v33, %v499_v57  ;;  %602 = vrot.lane.b32.xlu0 %v574_v54, %s1860_s14 }
 0x163   : > { %v503_v61 = vpop.f32.mrf.mxu0 }
 0x164   : > { %v576_v62 = vmax.f32 %v568_v59, 0.0  ;;  %v569_v63 = vadd.f32 %v557_v37, %v537_v60  ;;  %v538_v0 = vmul.f32 %v530_v32, %v503_v61  ;;  %604 = vrot.lane.b32.xlu1 %v575_v58, %s1860_s14 }
 0x165   : > { %v505_v1 = vpop.f32.mrf.mxu0 }
 0x166   : > { %v577_v2 = vmax.f32 %v569_v63, 0.0  ;;  %v570_v3 = vadd.f32 %v562_v35, %v538_v0  ;;  %v539_v4 = vmul.f32 %v530_v32, %v505_v1  ;;  %606 = vrot.lane.b32.xlu0 %v576_v62, %s1860_s14 }
 0x168   : > { %v578_v5 = vmax.f32 %v570_v3, 0.0  ;;  %v571_v6 = vadd.f32 %v562_v35, %v539_v4  ;;  %608 = vrot.lane.b32.xlu1 %v577_v2, %s1860_s14 }
 0x16a   : > { %v579_v8 = vmax.f32 %v571_v6, 0.0  ;;  %610 = vrot.lane.b32.xlu0 %v578_v5, %s1860_s14 }
 0x16c   : > { %612 = vrot.lane.b32.xlu1 %v579_v8, %s1860_s14 }
 0x1d0   : > { %v599_v9 = vpop.permute.xlu0 %598 }
 0x1d1   : > { %631 = vst.msk [vmem:[#allocation2] sm:$0xff] %vm630_vm4, %v599_v9 }
 0x1d2   : > { %v601_v10 = vpop.permute.xlu1 %600 }
 0x1d3   : > { %v2007_v11 = vsel %vm580_vm2, %v599_v9, %v601_v10  ;;  %633 = vst.msk [vmem:[#allocation2 + $0x10] sm:$0xff] %vm580_vm2, %v601_v10 }
 0x1d4   : > { %v603_v12 = vpop.permute.xlu0 %602 }
 0x1d5   : > { %634 = vst.msk [vmem:[#allocation2 + $0x18] sm:$0xff] %vm630_vm4, %v603_v12 }
 0x1d6   : > { %v605_v13 = vpop.permute.xlu1 %604 }
 0x1d7   : > { %v2012_v14 = vsel %vm580_vm2, %v603_v12, %v605_v13  ;;  %636 = vst.msk [vmem:[#allocation2 + $0x28] sm:$0xff] %vm580_vm2, %v605_v13 }
 0x1d8   : > { %v607_v15 = vpop.permute.xlu0 %606  ;;  %v2015_v16 = vld [vmem:[#allocation2] sm:$0xff] }
 0x1d9   : > { %637 = vst.msk [vmem:[#allocation2 + $0x30] sm:$0xff] %vm630_vm4, %v607_v15  ;;  %981 = vrot.lane.b32.xlu0 %v2015_v16, %s1861_s15  ;;  %674 = vrot.lane.b32.xlu1 %v2015_v16, %s1862_s16 }
 0x1da   : > { %v609_v17 = vpop.permute.xlu1 %608  ;;  %v2035_v23 = vld [vmem:[#allocation2 + $0x10] sm:$0xff] }
 0x1db   : > { %v2023_v19 = vsel %vm580_vm2, %v607_v15, %v609_v17  ;;  %639 = vst.msk [vmem:[#allocation2 + $0x40] sm:$0xff] %vm580_vm2, %v609_v17 }
 0x1dc   : > { %v611_v20 = vpop.permute.xlu0 %610  ;;  %v2061_v24 = vld [vmem:[#allocation2 + $0x18] sm:$0xff] }
 0x1dd   : > { %640 = vst.msk [vmem:[#allocation2 + $0x48] sm:$0xff] %vm630_vm4, %v611_v20  ;;  %1213 = vrot.lane.b32.xlu0 %v2015_v16, %s1863_s17  ;;  %866 = vrot.lane.b32.xlu1 %v2015_v16, %s1864_s18 }
 0x1de   : > { %v613_v21 = vpop.permute.xlu1 %612  ;;  %v653_v25 = vld [vmem:[#allocation2 + $0x28] sm:$0xff] }
 0x1df   : > { %v2032_v22 = vsel %vm580_vm2, %v611_v20, %v613_v21  ;;  %642 = vst.msk [vmem:[#allocation2 + $0x58] sm:$0xff] %vm580_vm2, %v613_v21 }
 0x1e0   : > { %v2107_v26 = vld [vmem:[#allocation2 + $0x30] sm:$0xff] }
 0x1e1   : > { %678 = vrot.lane.b32.xlu0 %v2035_v23, %s1862_s16  ;;  %1098 = vrot.lane.b32.xlu1 %v2015_v16, %s1865_s19 }
 0x1e2   : > { %v654_v27 = vld [vmem:[#allocation2 + $0x40] sm:$0xff] }
 0x1e4   : > { %v2145_v36 = vld [vmem:[#allocation2 + $0x48] sm:$0xff] }
 0x1e5   : > { %870 = vrot.lane.b32.xlu0 %v2035_v23, %s1864_s18  ;;  %1330 = vrot.lane.b32.xlu1 %v2015_v16, %s1866_s20 }
 0x1e6   : > { %v655_v55 = vld [vmem:[#allocation2 + $0x58] sm:$0xff] }
 0x1e9   : > { %983 = vrot.lane.b32.xlu0 %v2007_v11, %s1861_s15  ;;  %985 = vrot.lane.b32.xlu1 %v2035_v23, %s1861_s15 }
 0x1ed   : > { %1100 = vrot.lane.b32.xlu0 %v2007_v11, %s1865_s19  ;;  %1102 = vrot.lane.b32.xlu1 %v2035_v23, %s1865_s19 }
 0x1f1   : > { %1215 = vrot.lane.b32.xlu0 %v2007_v11, %s1863_s17  ;;  %1217 = vrot.lane.b32.xlu1 %v2035_v23, %s1863_s17 }
 0x1f5   : > { %1332 = vrot.lane.b32.xlu0 %v2007_v11, %s1866_s20  ;;  %1334 = vrot.lane.b32.xlu1 %v2035_v23, %s1866_s20 }
 0x1f9   : > { %680 = vrot.lane.b32.xlu0 %v2061_v24, %s1862_s16  ;;  %676 = vrot.lane.b32.xlu1 %v2007_v11, %s1862_s16 }
 0x1fd   : > { %872 = vrot.lane.b32.xlu0 %v2061_v24, %s1864_s18  ;;  %868 = vrot.lane.b32.xlu1 %v2007_v11, %s1864_s18 }
 0x201   : > { %987 = vrot.lane.b32.xlu0 %v2061_v24, %s1861_s15  ;;  %1104 = vrot.lane.b32.xlu1 %v2061_v24, %s1865_s19 }
 0x205   : > { %1219 = vrot.lane.b32.xlu0 %v2061_v24, %s1863_s17  ;;  %1336 = vrot.lane.b32.xlu1 %v2061_v24, %s1866_s20 }
 0x209   : > { %1455 = vrot.lane.b32.xlu0 %v2061_v24, %s1867_s21  ;;  %1574 = vrot.lane.b32.xlu1 %v2061_v24, %s1868_s22 }
 0x20d   : > { %682 = vrot.lane.b32.xlu0 %v2012_v14, %s1862_s16  ;;  %684 = vrot.lane.b32.xlu1 %v653_v25, %s1862_s16 }
 0x211   : > { %874 = vrot.lane.b32.xlu0 %v2012_v14, %s1864_s18  ;;  %876 = vrot.lane.b32.xlu1 %v653_v25, %s1864_s18 }
 0x215   : > { %989 = vrot.lane.b32.xlu0 %v2012_v14, %s1861_s15  ;;  %991 = vrot.lane.b32.xlu1 %v653_v25, %s1861_s15 }
 0x219   : > { %1106 = vrot.lane.b32.xlu0 %v2012_v14, %s1865_s19  ;;  %1108 = vrot.lane.b32.xlu1 %v653_v25, %s1865_s19 }
 0x21d   : > { %1221 = vrot.lane.b32.xlu0 %v2012_v14, %s1863_s17  ;;  %1223 = vrot.lane.b32.xlu1 %v653_v25, %s1863_s17 }
 0x221   : > { %1338 = vrot.lane.b32.xlu0 %v2012_v14, %s1866_s20  ;;  %1340 = vrot.lane.b32.xlu1 %v653_v25, %s1866_s20 }
 0x225   : > { %1457 = vrot.lane.b32.xlu0 %v2012_v14, %s1867_s21  ;;  %1459 = vrot.lane.b32.xlu1 %v653_v25, %s1867_s21 }
 0x229   : > { %1576 = vrot.lane.b32.xlu0 %v2012_v14, %s1868_s22  ;;  %1578 = vrot.lane.b32.xlu1 %v653_v25, %s1868_s22 }
 0x22d   : > { %993 = vrot.lane.b32.xlu0 %v2107_v26, %s1861_s15  ;;  %686 = vrot.lane.b32.xlu1 %v2107_v26, %s1862_s16 }
 0x231   : > { %1225 = vrot.lane.b32.xlu0 %v2107_v26, %s1863_s17  ;;  %878 = vrot.lane.b32.xlu1 %v2107_v26, %s1864_s18 }
 0x235   : > { %1461 = vrot.lane.b32.xlu0 %v2107_v26, %s1867_s21  ;;  %1110 = vrot.lane.b32.xlu1 %v2107_v26, %s1865_s19 }
 0x239   : > { %690 = vrot.lane.b32.xlu0 %v654_v27, %s1862_s16  ;;  %1342 = vrot.lane.b32.xlu1 %v2107_v26, %s1866_s20 }
 0x23d   : > { %882 = vrot.lane.b32.xlu0 %v654_v27, %s1864_s18  ;;  %1580 = vrot.lane.b32.xlu1 %v2107_v26, %s1868_s22 }
 0x241   : > { %995 = vrot.lane.b32.xlu0 %v2023_v19, %s1861_s15  ;;  %997 = vrot.lane.b32.xlu1 %v654_v27, %s1861_s15 }
 0x245   : > { %1112 = vrot.lane.b32.xlu0 %v2023_v19, %s1865_s19  ;;  %1114 = vrot.lane.b32.xlu1 %v654_v27, %s1865_s19 }
 0x249   : > { %1227 = vrot.lane.b32.xlu0 %v2023_v19, %s1863_s17  ;;  %1229 = vrot.lane.b32.xlu1 %v654_v27, %s1863_s17 }
 0x24b   : > { %v982_v28 = vpop.permute.xlu0 %981  ;;  %v675_v29 = vpop.permute.xlu1 %674 }
 0x24d   : > { %1344 = vrot.lane.b32.xlu0 %v2023_v19, %s1866_s20  ;;  %1346 = vrot.lane.b32.xlu1 %v654_v27, %s1866_s20 }
 0x24f   : > { %v1214_v30 = vpop.permute.xlu0 %1213  ;;  %v867_v31 = vpop.permute.xlu1 %866 }
 0x251   : > { %1463 = vrot.lane.b32.xlu0 %v2023_v19, %s1867_s21  ;;  %1465 = vrot.lane.b32.xlu1 %v654_v27, %s1867_s21 }
 0x253   : > { %v679_v32 = vpop.permute.xlu0 %678  ;;  %v1099_v33 = vpop.permute.xlu1 %1098 }
 0x255   : > { %1582 = vrot.lane.b32.xlu0 %v2023_v19, %s1868_s22  ;;  %1584 = vrot.lane.b32.xlu1 %v654_v27, %s1868_s22 }
 0x257   : > { %v871_v34 = vpop.permute.xlu0 %870  ;;  %v1331_v35 = vpop.permute.xlu1 %1330 }
 0x259   : > { %692 = vrot.lane.b32.xlu0 %v2145_v36, %s1862_s16  ;;  %688 = vrot.lane.b32.xlu1 %v2023_v19, %s1862_s16 }
 0x25b   : > { %v984_v37 = vpop.permute.xlu0 %983  ;;  %v986_v38 = vpop.permute.xlu1 %985 }
 0x25c   : > { %v2152_v39 = vsel %vm1005_vm5, %v982_v28, %v984_v37  ;;  %v2155_v40 = vsel %vm1005_vm5, %v984_v37, %v986_v38 }
 0x25d   : > { %884 = vrot.lane.b32.xlu0 %v2145_v36, %s1864_s18  ;;  %880 = vrot.lane.b32.xlu1 %v2023_v19, %s1864_s18 }
 0x25f   : > { %v1101_v41 = vpop.permute.xlu0 %1100  ;;  %v1103_v42 = vpop.permute.xlu1 %1102 }
 0x260   : > { %v2162_v43 = vsel %vm1122_vm6, %v1099_v33, %v1101_v41  ;;  %v2165_v44 = vsel %vm1122_vm6, %v1101_v41, %v1103_v42 }
 0x261   : > { %999 = vrot.lane.b32.xlu0 %v2145_v36, %s1861_s15  ;;  %1116 = vrot.lane.b32.xlu1 %v2145_v36, %s1865_s19 }
 0x263   : > { %v1216_v45 = vpop.permute.xlu0 %1215  ;;  %v1218_v46 = vpop.permute.xlu1 %1217 }
 0x264   : > { %v2172_v47 = vsel %vm1237_vm7, %v1214_v30, %v1216_v45  ;;  %v2175_v48 = vsel %vm1237_vm7, %v1216_v45, %v1218_v46 }
 0x265   : > { %1231 = vrot.lane.b32.xlu0 %v2145_v36, %s1863_s17  ;;  %1348 = vrot.lane.b32.xlu1 %v2145_v36, %s1866_s20 }
 0x267   : > { %v1333_v49 = vpop.permute.xlu0 %1332  ;;  %v1335_v50 = vpop.permute.xlu1 %1334 }
 0x268   : > { %v2182_v51 = vsel %vm1354_vm8, %v1331_v35, %v1333_v49  ;;  %v2185_v52 = vsel %vm1354_vm8, %v1333_v49, %v1335_v50 }
 0x269   : > { %1467 = vrot.lane.b32.xlu0 %v2145_v36, %s1867_s21  ;;  %1586 = vrot.lane.b32.xlu1 %v2145_v36, %s1868_s22 }
 0x26b   : > { %v681_v53 = vpop.permute.xlu0 %680  ;;  %v677_v54 = vpop.permute.xlu1 %676 }
 0x26c   : > { %v2192_v56 = vsel %vm698_vm9, %v677_v54, %v679_v32  ;;  %v2195_v57 = vsel %vm698_vm9, %v675_v29, %v677_v54 }
 0x26d   : > { %696 = vrot.lane.b32.xlu1 %v655_v55, %s1862_s16  ;;  %694 = vrot.lane.b32.xlu0 %v2032_v22, %s1862_s16 }
 0x26f   : > { %v873_v58 = vpop.permute.xlu0 %872  ;;  %v869_v59 = vpop.permute.xlu1 %868 }
 0x270   : > { %v2201_v60 = vsel %vm890_vm10, %v867_v31, %v869_v59  ;;  %v2204_v61 = vsel %vm890_vm10, %v869_v59, %v871_v34 }
 0x271   : > { %888 = vrot.lane.b32.xlu1 %v655_v55, %s1864_s18  ;;  %1451 = vrot.lane.b32.xlu0 %v2007_v11, %s1867_s21 }
 0x273   : > { %v988_v62 = vpop.permute.xlu0 %987  ;;  %v1105_v63 = vpop.permute.xlu1 %1104 }
 0x275   : > { %1003 = vrot.lane.b32.xlu1 %v655_v55, %s1861_s15  ;;  %886 = vrot.lane.b32.xlu0 %v2032_v22, %s1864_s18 }
 0x277   : > { %v1220_v0 = vpop.permute.xlu0 %1219  ;;  %v1337_v1 = vpop.permute.xlu1 %1336 }
 0x279   : > { %1120 = vrot.lane.b32.xlu1 %v655_v55, %s1865_s19  ;;  %1001 = vrot.lane.b32.xlu0 %v2032_v22, %s1861_s15 }
 0x27b   : > { %v1456_v2 = vpop.permute.xlu0 %1455  ;;  %v1575_v3 = vpop.permute.xlu1 %1574 }
 0x27d   : > { %1235 = vrot.lane.b32.xlu1 %v655_v55, %s1863_s17  ;;  %1118 = vrot.lane.b32.xlu0 %v2032_v22, %s1865_s19 }
 0x27f   : > { %v683_v4 = vpop.permute.xlu0 %682  ;;  %v685_v5 = vpop.permute.xlu1 %684 }
 0x280   : > { %v2219_v6 = vsel %vm698_vm9, %v683_v4, %v685_v5  ;;  %v2222_v8 = vsel %vm698_vm9, %v681_v53, %v683_v4 }
 0x281   : > { %1352 = vrot.lane.b32.xlu1 %v655_v55, %s1866_s20  ;;  %1233 = vrot.lane.b32.xlu0 %v2032_v22, %s1863_s17 }
 0x283   : > { %v875_v9 = vpop.permute.xlu0 %874  ;;  %v877_v10 = vpop.permute.xlu1 %876 }
 0x284   : > { %v2228_v12 = vsel %vm890_vm10, %v873_v58, %v875_v9  ;;  %v2231_v13 = vsel %vm890_vm10, %v875_v9, %v877_v10 }
 0x285   : > { %1471 = vrot.lane.b32.xlu1 %v655_v55, %s1867_s21  ;;  %1350 = vrot.lane.b32.xlu0 %v2032_v22, %s1866_s20 }
 0x287   : > { %v990_v15 = vpop.permute.xlu0 %989  ;;  %v992_v17 = vpop.permute.xlu1 %991 }
 0x288   : > { %v2237_v20 = vsel %vm1005_vm5, %v988_v62, %v990_v15  ;;  %v2240_v21 = vsel %vm1005_vm5, %v990_v15, %v992_v17 }
 0x289   : > { %1590 = vrot.lane.b32.xlu1 %v655_v55, %s1868_s22  ;;  %1469 = vrot.lane.b32.xlu0 %v2032_v22, %s1867_s21 }
 0x28b   : > { %v1107_v25 = vpop.permute.xlu0 %1106  ;;  %v1109_v27 = vpop.permute.xlu1 %1108 }
 0x28c   : > { %v2246_v28 = vsel %vm1122_vm6, %v1105_v63, %v1107_v25  ;;  %v2249_v29 = vsel %vm1122_vm6, %v1107_v25, %v1109_v27 }
 0x28d   : > { %1453 = vrot.lane.b32.xlu1 %v2035_v23, %s1867_s21  ;;  %1588 = vrot.lane.b32.xlu0 %v2032_v22, %s1868_s22 }
 0x28f   : > { %v1222_v30 = vpop.permute.xlu0 %1221  ;;  %v1224_v31 = vpop.permute.xlu1 %1223 }
 0x290   : > { %v2256_v32 = vsel %vm1237_vm7, %v1220_v0, %v1222_v30  ;;  %v2259_v33 = vsel %vm1237_vm7, %v1222_v30, %v1224_v31 }
 0x291   : > { %1572 = vrot.lane.b32.xlu1 %v2035_v23, %s1868_s22  ;;  %1570 = vrot.lane.b32.xlu0 %v2007_v11, %s1868_s22  ;;  %v1717_v23 = vld [vmem:[%s2488_s7] sm:$0xff] }
 0x293   : > { %v1339_v34 = vpop.permute.xlu0 %1338  ;;  %v1341_v35 = vpop.permute.xlu1 %1340 }
 0x294   : > { %v2266_v37 = vsel %vm1354_vm8, %v1337_v1, %v1339_v34  ;;  %v2269_v38 = vsel %vm1354_vm8, %v1339_v34, %v1341_v35 }
 0x295   : > { %1568 = vrot.lane.b32.xlu1 %v2015_v16, %s1868_s22  ;;  %1449 = vrot.lane.b32.xlu0 %v2015_v16, %s1867_s21 }
 0x297   : > { %v1458_v41 = vpop.permute.xlu0 %1457  ;;  %v1460_v42 = vpop.permute.xlu1 %1459 }
 0x298   : > { %v2279_v45 = vsel %vm1473_vm11, %v1456_v2, %v1458_v41  ;;  %v2282_v46 = vsel %vm1473_vm11, %v1458_v41, %v1460_v42 }
 0x299   : > { %2497 = vst [vmem:[#allocation4_spill] sm:$0xff] %v2279_v45  ;;  %2498 = vst [vmem:[#allocation5_spill] sm:$0xff] %v2282_v46  ;;  %1720 = vperm.xlu0 %1846, %v1717_v23  }
 0x29b   : > { %v1577_v49 = vpop.permute.xlu0 %1576  ;;  %v1579_v50 = vpop.permute.xlu1 %1578 }
 0x29c   : > { %v2285_v53 = vsel %vm1592_vm12, %v1575_v3, %v1577_v49  ;;  %v2288_v54 = vsel %vm1592_vm12, %v1577_v49, %v1579_v50 }
 0x29d   : > { %2499 = vst [vmem:[#allocation6_spill] sm:$0xff] %v2285_v53  ;;  %2500 = vst [vmem:[#allocation7_spill] sm:$0xff] %v2288_v54 }
 0x29f   : > { %v994_v55 = vpop.permute.xlu0 %993  ;;  %v687_v58 = vpop.permute.xlu1 %686 }
 0x2a3   : > { %v1226_v59 = vpop.permute.xlu0 %1225  ;;  %v2290_v62 = vpop.permute.xlu1 %878 }
 0x2a7   : > { %v1462_v63 = vpop.permute.xlu0 %1461  ;;  %v2292_v0 = vpop.permute.xlu1 %1110 }
 0x2ab   : > { %v691_v1 = vpop.permute.xlu0 %690  ;;  %v2294_v2 = vpop.permute.xlu1 %1342 }
 0x2af   : > { %v883_v4 = vpop.permute.xlu0 %882  ;;  %v1581_v5 = vpop.permute.xlu1 %1580 }
 0x2b3   : > { %v996_v9 = vpop.permute.xlu0 %995  ;;  %v998_v10 = vpop.permute.xlu1 %997 }
 0x2b4   : > { %v2297_v3 = vsel %vm1005_vm5, %v994_v55, %v996_v9  ;;  %v2300_v15 = vsel %vm1005_vm5, %v996_v9, %v998_v10 }
 0x2b7   : > { %v2302_v17 = vpop.permute.xlu0 %1112  ;;  %v2304_v25 = vpop.permute.xlu1 %1114 }
 0x2bb   : > { %v1228_v27 = vpop.permute.xlu0 %1227  ;;  %v1230_v30 = vpop.permute.xlu1 %1229 }
 0x2bc   : > { %v2307_v31 = vsel %vm1237_vm7, %v1226_v59, %v1228_v27  ;;  %v2310_v34 = vsel %vm1237_vm7, %v1228_v27, %v1230_v30 }
 0x2bf   : > { %v2312_v35 = vpop.permute.xlu0 %1344  ;;  %v2314_v23 = vpop.permute.xlu1 %1346 }
 0x2c3   : > { %v1464_v41 = vpop.permute.xlu0 %1463  ;;  %v1466_v42 = vpop.permute.xlu1 %1465 }
 0x2c4   : > { %v2317_v49 = vsel %vm1473_vm11, %v1462_v63, %v1464_v41  ;;  %v2320_v50 = vsel %vm1473_vm11, %v1464_v41, %v1466_v42 }
 0x2c5   : > { %2501 = vst [vmem:[#allocation8_spill] sm:$0xff] %v2317_v49  ;;  %2502 = vst [vmem:[#allocation9_spill] sm:$0xff] %v2320_v50 }
 0x2c7   : > { %v1583_v55 = vpop.permute.xlu0 %1582  ;;  %v1585_v9 = vpop.permute.xlu1 %1584 }
 0x2c8   : > { %v2323_v59 = vsel %vm1592_vm12, %v1581_v5, %v1583_v55  ;;  %v2326_v10 = vsel %vm1592_vm12, %v1583_v55, %v1585_v9 }
 0x2c9   : > { %2503 = vst [vmem:[#allocation10_spill] sm:$0xff] %v2323_v59  ;;  %2504 = vst [vmem:[#allocation11_spill] sm:$0xff] %v2326_v10 }
 0x2cb   : > { %v693_v27 = vpop.permute.xlu0 %692  ;;  %v689_v30 = vpop.permute.xlu1 %688 }
 0x2cc   : > { %v704_v9 = vsel %vm698_vm9, %v689_v30, %v691_v1  ;;  %v703_v50 = vsel %vm698_vm9, %v687_v58, %v689_v30 }
 0x2cf   : > { %v885_v7 = vpop.permute.xlu0 %884  ;;  %v881_v18 = vpop.permute.xlu1 %880 }
 0x2d3   : > { %v1000_v53 = vpop.permute.xlu0 %999  ;;  %v1117_v45 = vpop.permute.xlu1 %1116 }
 0x2d7   : > { %v2328_v54 = vpop.permute.xlu0 %1231  ;;  %v2330_v63 = vpop.permute.xlu1 %1348 }
 0x2db   : > { %v2332_v41 = vpop.permute.xlu0 %1467  ;;  %v2334_v42 = vpop.permute.xlu1 %1586 }
 0x2dc   : > { %2505 = vst [vmem:[#allocation12_spill] sm:$0xff] %v2332_v41 }
 0x2df   : > { %v695_v46 = vpop.permute.xlu0 %694  ;;  %v697_v5 = vpop.permute.xlu1 %696 }
 0x2e0   : > { %v706_v59 = vsel %vm698_vm9, %v695_v46, %v697_v5  ;;  %v705_v55 = vsel %vm698_vm9, %v693_v27, %v695_v46  ;;  %v1807_v46 = vld [vmem:[%s2487_s6 + $0x18] sm:$0xff] }
 0x2e1   : > { %743 = vmatprep.subr.mxu1 %v706_v59  ;;  %v2515_v59 = vld [vmem:[#allocation6_spill] sm:$0xff] }
 0x2e2   : > { %744 = vmatpush1.msra.mxu1 %v705_v55 }
 0x2e3   : > { %v2339_v49 = vpop.permute.xlu0 %1451  ;;  %745 = vmatprep.subr.mxu1 %v704_v9  ;;  %v889_v10 = vpop.permute.xlu1 %888 }
 0x2e4   : > { %746 = vmatpush1.msra.mxu1 %v703_v50  ;;  %v2514_v50 = vld [vmem:[#allocation4_spill] sm:$0xff] }
 0x2e5   : > { %747 = vmatprep.subr.mxu1 %v2219_v6  ;;  %v895_v6 = vsel %vm890_vm10, %v2290_v62, %v881_v18  ;;  %v1359_v62 = vsel %vm1354_vm8, %v2294_v2, %v2312_v35  ;;  %v1816_v2 = vld [vmem:[%s2487_s6 + $0x30] sm:$0xff] }
 0x2e6   : > { %748 = vmatpush1.msra.mxu1 %v2222_v8 }
 0x2e7   : > { %v887_v41 = vpop.permute.xlu0 %886  ;;  %749 = vmatprep.subr.mxu1 %v2192_v56  ;;  %v1004_v5 = vpop.permute.xlu1 %1003  ;;  %v896_v56 = vsel %vm890_vm10, %v881_v18, %v883_v4 }
 0x2e8   : > { %v897_v1 = vsel %vm890_vm10, %v885_v7, %v887_v41  ;;  %750 = vmatpush1.msra.mxu1 %v2195_v57  ;;  %v898_v58 = vsel %vm890_vm10, %v887_v41, %v889_v10  ;;  %v1820_v41 = vld [vmem:[%s2487_s6 + $0x40] sm:$0xff] }
 0x2e9   : > { %817 = vmatprep.subr.mxu1 %v2032_v22  ;;  %934 = vmatprep.subr.mxu0 %v898_v58 }
 0x2ea   : > { %1808 = vmatmul.mubr.msk.f32.vlgmr.msra.gmra.mxu1 %vm715_vm13, %v1807_v46  ;;  %935 = vmatpush1.msra.mxu0 %v897_v1 }
 0x2eb   : > { %818 = vmatpush1.msra.mxu1 %v2145_v36  ;;  %v1002_v8 = vpop.permute.xlu0 %1001  ;;  %936 = vmatprep.subr.mxu0 %v896_v56  ;;  %v1121_v7 = vpop.permute.xlu1 %1120  ;;  %v651_v36 = vld [vmem:[%s2487_s6] sm:$0xff] }
 0x2ec   : > { %819 = vmatprep.subr.mxu1 %v2023_v19  ;;  %937 = vmatpush1.msra.mxu0 %v895_v6  ;;  %v2506_v19 = vmov 0.0   ;;  %v1013_v57 = vsel %vm1005_vm5, %v1002_v8, %v1004_v5 }
 0x2ed   : > { %820 = vmatpush1.msra.mxu1 %v2107_v26  ;;  %938 = vmatprep.subr.mxu0 %v2231_v13 }
 0x2ee   : > { %821 = vmatprep.subr.mxu1 %v2012_v14  ;;  %939 = vmatpush1.msra.mxu0 %v2228_v12  ;;  %v1810_v14 = vld [vmem:[%s2487_s6 + $0x20] sm:$0xff] }
 0x2ef   : > { %822 = vmatpush1.msra.mxu1 %v2061_v24  ;;  %v1119_v22 = vpop.permute.xlu0 %1118  ;;  %940 = vmatprep.subr.mxu0 %v2204_v61  ;;  %v1236_v18 = vpop.permute.xlu1 %1235 }
 0x2f0   : > { %823 = vmatprep.subr.mxu1 %v2007_v11  ;;  %857 = vmatprep.mubr.f32.mxu1 %v2506_v19  ;;  %v1130_v26 = vsel %vm1122_vm6, %v1119_v22, %v1121_v7  ;;  %v1129_v24 = vsel %vm1122_vm6, %v1117_v45, %v1119_v22  ;;  %v1012_v11 = vsel %vm1005_vm5, %v1000_v53, %v1002_v8  ;;  %v1805_v53 = vld [vmem:[%s2487_s6 + $0x8] sm:$0xff]  ;;  %v2516_v7 = vld [vmem:[#allocation3_spill] sm:$0xff] }
 0x2f1   : > { %824 = vmatpush1.msra.mxu1 %v2015_v16  ;;  %941 = vmatpush1.msra.mxu0 %v2201_v60  ;;  %v1128_v16 = vsel %vm1122_vm6, %v2302_v17, %v2304_v25  ;;  %v1127_v60 = vsel %vm1122_vm6, %v2292_v0, %v2302_v17  ;;  %v2509_v17 = vld [vmem:[#allocation11_spill] sm:$0xff]  ;;  %v2510_v25 = vld [vmem:[#allocation8_spill] sm:$0xff]  ;;  %v1689_v22 = vsub.s32 0, %v2516_v7 }
 0x2f2   : > { %1809 = vmatmul.mubr.msk.f32.vlgmr.msra.gmra.mxu1 %vm715_vm13, %v651_v36  ;;  %1049 = vmatprep.subr.mxu1 %v1013_v57  ;;  %v1685_v36 = vld [vmem:[%s2489_s8] sm:$0x3] }
 0x2f3   : > { %1166 = vmatprep.subr.mxu0 %v1130_v26  ;;  %1811 = vmatmul.mubr.msk.f32.vlgmr.msra.gmra.mxu0 %vm715_vm13, %v1810_v14  ;;  %v1234_v61 = vpop.permute.xlu0 %1233  ;;  %v1353_v12 = vpop.permute.xlu1 %1352  ;;  %v1701_v57 = vld [vmem:[%s2490_s9] sm:$0x3] }
 0x2f4   : > { %1050 = vmatpush1.msra.mxu1 %v1012_v11  ;;  %1167 = vmatpush1.msra.mxu0 %v1129_v24 }
 0x2f5   : > { %1051 = vmatprep.subr.mxu1 %v2300_v15  ;;  %1168 = vmatprep.subr.mxu0 %v1128_v16  ;;  %v2508_v15 = vld [vmem:[#allocation9_spill] sm:$0xff] }
 0x2f6   : > { %1052 = vmatpush1.msra.mxu1 %v2297_v3  ;;  %1169 = vmatpush1.msra.mxu0 %v1127_v60 }
 0x2f7   : > { %1053 = vmatprep.subr.mxu1 %v2240_v21  ;;  %1170 = vmatprep.subr.mxu0 %v2249_v29  ;;  %v1351_v13 = vpop.permute.xlu0 %1350  ;;  %v1472_v45 = vpop.permute.xlu1 %1471 }
 0x2f8   : > { %1054 = vmatpush1.msra.mxu1 %v2237_v20  ;;  %1171 = vmatpush1.msra.mxu0 %v2246_v28  ;;  %v1362_v21 = vsel %vm1354_vm8, %v1351_v13, %v1353_v12  ;;  %v1813_v20 = vld [vmem:[%s2487_s6 + $0x28] sm:$0xff]  ;;  %v1361_v28 = vsel %vm1354_vm8, %v2330_v63, %v1351_v13  ;;  %v1818_v63 = vld [vmem:[%s2487_s6 + $0x38] sm:$0xff] }
 0x2f9   : > { %1055 = vmatprep.subr.mxu1 %v2155_v40  ;;  %1172 = vmatprep.subr.mxu0 %v2165_v44  ;;  %v1245_v40 = vsel %vm1237_vm7, %v1234_v61, %v1236_v18 }
 0x2fa   : > { %1056 = vmatpush1.msra.mxu1 %v2152_v39  ;;  %1089 = vmatprep.mubr.f32.mxu1 %v2506_v19  ;;  %v1244_v39 = vsel %vm1237_vm7, %v2328_v54, %v1234_v61  ;;  %v1806_v54 = vld [vmem:[%s2487_s6 + $0x10] sm:$0xff]  ;;  %v1690_v61 = vrot.slane %v1685_v36, %v1689_v22 }
 0x2fb   : > { %1173 = vmatpush1.msra.mxu0 %v2162_v43  ;;  %1812 = vmatmul.mubr.msk.f32.vlgmr.msra.gmra.mxu1 %vm715_vm13, %v1805_v53  ;;  %v1470_v44 = vpop.permute.xlu0 %1469  ;;  %v1591_v29 = vpop.permute.xlu1 %1590  ;;  %v1360_v43 = vsel %vm1354_vm8, %v2312_v35, %v2314_v23  ;;  %v2513_v35 = vld [vmem:[#allocation7_spill] sm:$0xff]  ;;  %v1706_v53 = vrot.slane %v1701_v57, %v1689_v22 }
 0x2fc   : > { %1206 = vmatprep.mubr.f32.mxu0 %v2506_v19  ;;  %1281 = vmatprep.subr.mxu1 %v1245_v40 }
 0x2fd   : > { %1398 = vmatprep.subr.mxu0 %v1362_v21  ;;  %1814 = vmatmul.mubr.msk.f32.vlgmr.msra.gmra.mxu0 %vm715_vm13, %v1813_v20 }
 0x2fe   : > { %1282 = vmatpush1.msra.mxu1 %v1244_v39  ;;  %1399 = vmatpush1.msra.mxu0 %v1361_v28 }
 0x2ff   : > { %1283 = vmatprep.subr.mxu1 %v2310_v34  ;;  %1400 = vmatprep.subr.mxu0 %v1360_v43  ;;  %v1589_v0 = vpop.permute.xlu0 %1588  ;;  %v1454_v4 = vpop.permute.xlu1 %1453  ;;  %v2512_v34 = vld [vmem:[#allocation5_spill] sm:$0xff] }
 0x300   : > { %1284 = vmatpush1.msra.mxu1 %v2307_v31  ;;  %1401 = vmatpush1.msra.mxu0 %v1359_v62  ;;  %v2511_v31 = vld [vmem:[#allocation10_spill] sm:$0xff]  ;;  %v1475_v10 = vsel %vm1473_vm11, %v2339_v49, %v1454_v4 }
 0x301   : > { %1285 = vmatprep.subr.mxu1 %v2259_v33  ;;  %1402 = vmatprep.subr.mxu0 %v2269_v38 }
 0x302   : > { %1286 = vmatpush1.msra.mxu1 %v2256_v32  ;;  %1403 = vmatpush1.msra.mxu0 %v2266_v37  ;;  %v1600_v32 = vsel %vm1592_vm12, %v1589_v0, %v1591_v29  ;;  %v2507_v37 = vld [vmem:[#allocation12_spill] sm:$0xff] }
 0x303   : > { %1287 = vmatprep.subr.mxu1 %v2175_v48  ;;  %1404 = vmatprep.subr.mxu0 %v2185_v52  ;;  %v1571_v3 = vpop.permute.xlu0 %1570  ;;  %v1573_v33 = vpop.permute.xlu1 %1572  ;;  %v1599_v48 = vsel %vm1592_vm12, %v2334_v42, %v1589_v0  ;;  %v1481_v52 = vsel %vm1473_vm11, %v1470_v44, %v1472_v45 }
 0x304   : > { %1288 = vmatpush1.msra.mxu1 %v2172_v47  ;;  %1321 = vmatprep.mubr.f32.mxu1 %v2506_v19  ;;  %v1480_v47 = vsel %vm1473_vm11, %v2507_v37, %v1470_v44  ;;  %v1594_v27 = vsel %vm1592_vm12, %v1571_v3, %v1573_v33 }
 0x305   : > { %1405 = vmatpush1.msra.mxu0 %v2182_v51  ;;  %1438 = vmatprep.mubr.f32.mxu0 %v2506_v19 }
 0x306   : > { %1815 = vmatmul.mubr.msk.f32.vlgmr.msra.gmra.mxu1 %vm715_vm13, %v1806_v54  ;;  %1817 = vmatmul.mubr.msk.f32.vlgmr.msra.gmra.mxu0 %vm715_vm13, %v1816_v2 }
 0x307   : > { %1517 = vmatprep.subr.mxu1 %v1481_v52  ;;  %1636 = vmatprep.subr.mxu0 %v1600_v32  ;;  %v1450_v38 = vpop.permute.xlu0 %1449  ;;  %v1569_v51 = vpop.permute.xlu1 %1568 }
 0x308   : > { %1518 = vmatpush1.msra.mxu1 %v1480_v47  ;;  %1637 = vmatpush1.msra.mxu0 %v1599_v48  ;;  %v1474_v23 = vsel %vm1473_vm11, %v1450_v38, %v2339_v49  ;;  %v1593_v30 = vsel %vm1592_vm12, %v1569_v51, %v1571_v3 }
 0x309   : > { %1519 = vmatprep.subr.mxu1 %v2508_v15  ;;  %1638 = vmatprep.subr.mxu0 %v2509_v17 }
 0x30a   : > { %1520 = vmatpush1.msra.mxu1 %v2510_v25  ;;  %1639 = vmatpush1.msra.mxu0 %v2511_v31 }
 0x30b   : > { %1521 = vmatprep.subr.mxu1 %v2512_v34  ;;  %1640 = vmatprep.subr.mxu0 %v2513_v35 }
 0x30c   : > { %1522 = vmatpush1.msra.mxu1 %v2514_v50  ;;  %1641 = vmatpush1.msra.mxu0 %v2515_v59 }
 0x30d   : > { %1523 = vmatprep.subr.mxu1 %v1475_v10  ;;  %1642 = vmatprep.subr.mxu0 %v1594_v27 }
 0x30e   : > { %1524 = vmatpush1.msra.mxu1 %v1474_v23  ;;  %1557 = vmatprep.mubr.f32.mxu1 %v2506_v19 }
 0x30f   : > { %1643 = vmatpush1.msra.mxu0 %v1593_v30  ;;  %1676 = vmatprep.mubr.f32.mxu0 %v2506_v19  ;;  %v1693_v19 = vsub.s32 1, %v2516_v7 }
 0x310   : > { %1819 = vmatmul.mubr.msk.f32.vlgmr.msra.gmra.mxu1 %vm715_vm13, %v1818_v63  ;;  %1821 = vmatmul.mubr.msk.f32.vlgmr.msra.gmra.mxu0 %vm715_vm13, %v1820_v41 }
 0x311   : > { %v1694_v60 = vrot.slane %v1685_v36, %v1693_v19  ;;  %v1710_v40 = vrot.slane %v1701_v57, %v1693_v19 }
 0x314   : > { %v1721_v37 = vpop.permute.xlu0 %1720 }
 0x3aa   : > { %v785_v49 = vpop.f32.mrf.mxu1 }
 0x3ac   : > { %v787_v55 = vpop.f32.mrf.mxu1 }
 0x3b2   : > { %v859_v9 = vpop.f32.mrf.mxu1 }
 0x3b3   : > { %v976_v42 = vpop.f32.mrf.mxu0  ;;  %v860_v26 = vadd.f32 %v859_v9, %v785_v49 }
 0x3b4   : > { %v861_v1 = vpop.f32.mrf.mxu1 }
 0x3b5   : > { %v978_v5 = vpop.f32.mrf.mxu0  ;;  %v862_v24 = vadd.f32 %v861_v1, %v787_v55 }
 0x3bb   : > { %v1091_v58 = vpop.f32.mrf.mxu1 }
 0x3bc   : > { %v1092_v13 = vadd.f32 %v1091_v58, %v976_v42 }
 0x3bd   : > { %v1208_v46 = vpop.f32.mrf.mxu0  ;;  %v1093_v8 = vpop.f32.mrf.mxu1 }
 0x3be   : > { %v1094_v21 = vadd.f32 %v1093_v8, %v978_v5 }
 0x3bf   : > { %v1210_v56 = vpop.f32.mrf.mxu0 }
 0x3c6   : > { %v1440_v6 = vpop.f32.mrf.mxu0  ;;  %v1323_v18 = vpop.f32.mrf.mxu1 }
 0x3c7   : > { %v1445_v11 = vadd.f32 %v1440_v6, %v860_v26  ;;  %v1324_v45 = vadd.f32 %v1323_v18, %v1208_v46 }
 0x3c8   : > { %v1442_v14 = vpop.f32.mrf.mxu0  ;;  %v1325_v12 = vpop.f32.mrf.mxu1 }
 0x3c9   : > { %v1446_v16 = vadd.f32 %v1442_v14, %v862_v24  ;;  %v1697_v44 = vmul.f32 %v1690_v61, %v1445_v11  ;;  %v1326_v29 = vadd.f32 %v1325_v12, %v1210_v56 }
 0x3cb   : > { %v1698_v62 = vmul.f32 %v1694_v60, %v1446_v16 }
 0x3d0   : > { %v1559_v20 = vpop.f32.mrf.mxu1  ;;  %v1678_v28 = vpop.f32.mrf.mxu0 }
 0x3d1   : > { %v1564_v39 = vadd.f32 %v1559_v20, %v1092_v13  ;;  %v1683_v43 = vadd.f32 %v1678_v28, %v1324_v45 }
 0x3d2   : > { %v1561_v0 = vpop.f32.mrf.mxu1  ;;  %v1680_v4 = vpop.f32.mrf.mxu0 }
 0x3d3   : > { %v1699_v54 = vadd.f32 %v1697_v44, %v1564_v39  ;;  %v1713_v2 = vmul.f32 %v1706_v53, %v1683_v43  ;;  %v1565_v3 = vadd.f32 %v1561_v0, %v1094_v21  ;;  %v1684_v33 = vadd.f32 %v1680_v4, %v1326_v29 }
 0x3d5   : > { %v1715_v32 = vadd.f32 %v1713_v2, %v1699_v54  ;;  %v1700_v48 = vadd.f32 %v1698_v62, %v1565_v3  ;;  %v1714_v52 = vmul.f32 %v1710_v40, %v1684_v33 }
 0x3d7   : > { %v1723_v47 = vadd.f32 %v1721_v37, %v1715_v32  ;;  %v1716_v38 = vadd.f32 %v1714_v52, %v1700_v48 }
 0x3d9   : > { %v1727_v15 = vrot.slane %v1723_v47, 4  ;;  %v1724_v17 = vadd.f32 %v1721_v37, %v1716_v38 }
 0x3db   : > { %1731 = vst [vmem:[%s1947_s28 + $0x10] ss:$-12 sps:$4 sm:$0xff] %v1727_v15   ;;  %v1728_v51 = vrot.slane %v1724_v17, 4 }
 0x3dd   : > { %1732 = vst [vmem:[%s1947_s28 + $0x18] ss:$-12 sps:$4 sm:$0xff] %v1728_v51  }
 0x3de PF: > { %s20_s13 = sadd.s32 1, %s1855_s13  }
 0x3df   : > { %p17_p4 = scmp.ge.s32.totalorder %s20_s13, 4  }
 0x3e1   :  { %19 = sbr.rel (!%p17_p4) target bundleno = 1 (0x1), region = 98 }

</bundles_post_ra>
